<compile_context>
chip_gen: v5e
topology: v5e:2x2
jax: 0.10.0
libtpu: 0.0.40
codegen_flags: <defaults>
</compile_context>

<pallas_src>
import functools

import jax
import jax.numpy as jnp
from jax import lax
from jax.experimental import pallas as pl
from jax.experimental.pallas import tpu as pltpu


# ----------------------------------------------------------------------------
# Single fused Pallas kernel: conv3x3 (block-Toeplitz matmul) + bias + ReLU
#                             -> fc1 (H chunked matmuls) + bias + ReLU
#                             -> fc2 + bias
# ----------------------------------------------------------------------------
def _fused_forward_kernel(lhs_ref, wc_ref, bc_ref, w1_ref, b1_ref,
                          w2_ref, b2_ref, o_ref, *, n_h, b_pad, lane_k):
    # conv as one MXU matmul:
    #   [H*B_pad, 3*(W+2)*C_in] @ [3*(W+2)*C_in, W*C_out] -> [H*B_pad, W*C_out]
    # rows ordered (h, b_pad) so each h-chunk below is exactly vreg-row aligned,
    # columns ordered (w, c_out) -> lane-dense 128-wide tile.
    conv = jnp.dot(lhs_ref[...], wc_ref[...], preferred_element_type=jnp.float32)
    conv = jnp.maximum(conv + bc_ref[...], 0.0)

    # fc1: hidden[b] = sum_{h,w,c} feat[b,h,w,c] * W1[(h,w,c), :]
    # done as n_h accumulated [B_pad, lane_k] @ [lane_k, hidden] matmuls over
    # sublane-aligned slices (b_pad is a multiple of 8, lane_k = W*C_out = 128).
    hidden = w1_ref.shape[1]
    acc = jnp.zeros((b_pad, hidden), jnp.float32)
    for h in range(n_h):                                   # static, fully unrolled
        a_h = conv[h * b_pad:(h + 1) * b_pad, :]           # [B_pad, lane_k]
        w_h = w1_ref[h * lane_k:(h + 1) * lane_k, :]       # [lane_k, hidden]
        acc = acc + jnp.dot(a_h, w_h, preferred_element_type=jnp.float32)
    hid = jnp.maximum(acc + b1_ref[...], 0.0)              # [B_pad, hidden]

    # fc2 action head
    out = jnp.dot(hid, w2_ref[...], preferred_element_type=jnp.float32) + b2_ref[...]
    o_ref[...] = out.astype(o_ref.dtype)


def _fused_forward_call(lhs, wc, bc_row, w1, b1_row, w2, b2_row, *, n_h, b_pad):
    m, kc = lhs.shape
    lane_k = wc.shape[1]          # W * C_out (== 128 at the reference shapes)
    hidden = w1.shape[1]
    n_act = w2.shape[1]
    kern = functools.partial(_fused_forward_kernel,
                             n_h=n_h, b_pad=b_pad, lane_k=lane_k)
    return pl.pallas_call(
        kern,
        out_shape=jax.ShapeDtypeStruct((b_pad, n_act), jnp.float32),
        grid=(1,),                                   # whole problem, one VMEM-resident step
        in_specs=[
            pl.BlockSpec((m, kc), lambda i: (0, 0)),
            pl.BlockSpec((kc, lane_k), lambda i: (0, 0)),
            pl.BlockSpec((1, lane_k), lambda i: (0, 0)),
            pl.BlockSpec((n_h * lane_k, hidden), lambda i: (0, 0)),
            pl.BlockSpec((1, hidden), lambda i: (0, 0)),
            pl.BlockSpec((hidden, n_act), lambda i: (0, 0)),
            pl.BlockSpec((1, n_act), lambda i: (0, 0)),
        ],
        out_specs=pl.BlockSpec((b_pad, n_act), lambda i: (0, 0)),
        compiler_params=pltpu.CompilerParams(
            dimension_semantics=("arbitrary",)),
    )(lhs, wc, bc_row, w1, b1_row, w2, b2_row)


# ----------------------------------------------------------------------------
# One-time weight repacking (run once; NOT part of the per-forward hot path)
# ----------------------------------------------------------------------------
def prepare_params(params, *, h, w):
    conv_w = params["conv_w"]            # [C_out, C_in, 3, 3]  (PyTorch OIHW)
    conv_b = params["conv_b"]            # [C_out]
    fc1_w = params["fc1_w"]              # [C_out*H*W, hidden], rows in (c, h, w) order
    c_out, c_in, kh, kw = conv_w.shape
    hidden = fc1_w.shape[1]
    wp = w + 2

    # Block-Toeplitz conv weight: rows (dy, w_padded, c_in), cols (w, c_out).
    #   rhs[(dy, wp, ci), (x, co)] = conv_w[co, ci, dy, wp - x]  for wp - x in {0,1,2}
    k4 = jnp.transpose(conv_w, (2, 3, 1, 0))               # [dy, dx, ci, co]
    toep = jnp.zeros((kh, wp, c_in, w, c_out), conv_w.dtype)
    for x in range(w):
        toep = toep.at[:, x:x + kw, :, x, :].set(k4)
    wc = toep.reshape(kh * wp * c_in, w * c_out)

    bc_row = jnp.tile(conv_b, w)[None, :]                  # [1, W*C_out], (w, co) order

    # Pre-permute fc1_w rows from (c, h, w) [PyTorch NCHW flatten] to (h, w, c)
    # so fc1 consumes the conv tile's (w, c_out) column layout directly.
    w1 = fc1_w.reshape(c_out, h, w, hidden)
    w1 = jnp.transpose(w1, (1, 2, 0, 3)).reshape(h * w * c_out, hidden)

    return {
        "wc": wc, "bc_row": bc_row,
        "w1": w1, "b1_row": params["fc1_b"][None, :],
        "w2": params["fc2_w"], "b2_row": params["fc2_b"][None, :],
    }


# ----------------------------------------------------------------------------
# FullModel forward (feature_model -> action_model), single fused kernel
# ----------------------------------------------------------------------------
@jax.jit
def full_model_forward(x_nchw, prep):
    """x: [B, C_in, H, W] (NCHW, PyTorch convention) -> [B, num_actions]."""
    B, c_in, H, W = x_nchw.shape
    b_pad = ((B + 7) // 8) * 8          # pad batch to a sublane multiple

    # Cheap XLA glue on the tiny activation: 3 row-shifted taps of the padded
    # NHWC image, rows ordered (h, b_pad), cols ordered (dy, w_padded, c_in).
    x_nhwc = jnp.transpose(x_nchw, (0, 2, 3, 1))
    xp = jnp.pad(x_nhwc, ((0, 0), (1, 1), (1, 1), (0, 0)))          # [B, H+2, W+2, C]
    taps = jnp.stack([xp[:, dy:dy + H] for dy in range(3)], axis=2)  # [B, H, 3, W+2, C]
    lhs = jnp.transpose(taps, (1, 0, 2, 3, 4)).reshape(H, B, 3 * (W + 2) * c_in)
    lhs = jnp.pad(lhs, ((0, 0), (0, b_pad - B), (0, 0)))
    lhs = lhs.reshape(H * b_pad, 3 * (W + 2) * c_in)                 # [H*B_pad, 216]

    out = _fused_forward_call(lhs, prep["wc"], prep["bc_row"], prep["w1"],
                              prep["b1_row"], prep["w2"], prep["b2_row"],
                              n_h=H, b_pad=b_pad)
    return out[:B]


# ----------------------------------------------------------------------------
# Deterministic parameter init (same layout/convention as before)
# ----------------------------------------------------------------------------
def init_params(key, c_in=4, c_out=8, h=16, w=16, hidden=32, num_actions=6):
    ks = jax.random.split(key, 6)
    scale = 0.05
    return {
        "conv_w": scale * jax.random.normal(ks[0], (c_out, c_in, 3, 3), jnp.float32),
        "conv_b": scale * jax.random.normal(ks[1], (c_out,), jnp.float32),
        "fc1_w": scale * jax.random.normal(ks[2], (c_out * h * w, hidden), jnp.float32),
        "fc1_b": scale * jax.random.normal(ks[3], (hidden,), jnp.float32),
        "fc2_w": scale * jax.random.normal(ks[4], (hidden, num_actions), jnp.float32),
        "fc2_b": scale * jax.random.normal(ks[5], (num_actions,), jnp.float32),
    }


# Pure-JAX reference (independent path: XLA conv + dense)
def ref_forward(x_nchw, params):
    conv = lax.conv_general_dilated(
        x_nchw, params["conv_w"], window_strides=(1, 1), padding="SAME",
        dimension_numbers=("NCHW", "OIHW", "NCHW"),
        precision=lax.Precision.HIGHEST)
    conv = jnp.maximum(conv + params["conv_b"][None, :, None, None], 0.0)
    feat = conv.reshape(conv.shape[0], -1)          # PyTorch NCHW flatten (c, h, w)
    hid = jnp.maximum(
        jnp.dot(feat, params["fc1_w"], precision=lax.Precision.HIGHEST)
        + params["fc1_b"], 0.0)
    return (jnp.dot(hid, params["fc2_w"], precision=lax.Precision.HIGHEST)
            + params["fc2_b"])


if __name__ == "__main__":
    key = jax.random.PRNGKey(0)
    k_x, k_p = jax.random.split(key)

    B, C_in, H, W = 2, 4, 16, 16
    x = jax.random.normal(k_x, (B, C_in, H, W), jnp.float32)   # NCHW input
    params = init_params(k_p, c_in=C_in, h=H, w=W)

    prep = prepare_params(params, h=H, w=W)        # one-time weight repack
    prep = jax.tree_util.tree_map(jax.block_until_ready, prep)

    out = full_model_forward(x, prep)
    out = jax.block_until_ready(out)
    assert out.shape == (B, 6), out.shape

    ref = ref_forward(x, params)
    err = float(jnp.max(jnp.abs(out - ref)))
    assert jnp.allclose(out, ref, atol=1e-2, rtol=1e-2), err

    print("KERNEL_OK")
</pallas_src>

<mosaic_0001>
module attributes {stable_mosaic.version = 11 : i64} {
  func.func @_fused_forward_kernel(%arg0: i32, %arg1: memref<128x216xf32, #tpu.memory_space<vmem>>, %arg2: memref<216x128xf32, #tpu.memory_space<vmem>>, %arg3: memref<1x128xf32, #tpu.memory_space<vmem>>, %arg4: memref<2048x32xf32, #tpu.memory_space<vmem>>, %arg5: memref<1x32xf32, #tpu.memory_space<vmem>>, %arg6: memref<32x6xf32, #tpu.memory_space<vmem>>, %arg7: memref<1x6xf32, #tpu.memory_space<vmem>>, %arg8: memref<8x6xf32, #tpu.memory_space<vmem>>) attributes {dimension_semantics = [#tpu.dimension_semantics<arbitrary>], iteration_bounds = array<i64: 1>, scalar_prefetch = 0 : i64, scratch_operands = 0 : i64, tpu.core_type = #tpu.core_type<tc>, window_params = [{pipeline_mode = #tpu.pipeline_mode<synchronous>, transform_indices = @transform_0, window_bounds = array<i64: 128, 216>}, {pipeline_mode = #tpu.pipeline_mode<synchronous>, transform_indices = @transform_1, window_bounds = array<i64: 216, 128>}, {pipeline_mode = #tpu.pipeline_mode<synchronous>, transform_indices = @transform_2, window_bounds = array<i64: 1, 128>}, {pipeline_mode = #tpu.pipeline_mode<synchronous>, transform_indices = @transform_3, window_bounds = array<i64: 2048, 32>}, {pipeline_mode = #tpu.pipeline_mode<synchronous>, transform_indices = @transform_4, window_bounds = array<i64: 1, 32>}, {pipeline_mode = #tpu.pipeline_mode<synchronous>, transform_indices = @transform_5, window_bounds = array<i64: 32, 6>}, {pipeline_mode = #tpu.pipeline_mode<synchronous>, transform_indices = @transform_6, window_bounds = array<i64: 1, 6>}, {pipeline_mode = #tpu.pipeline_mode<synchronous>, transform_indices = @transform_7, window_bounds = array<i64: 8, 6>}]} {
    %c0 = arith.constant 0 : index
    %c0_0 = arith.constant 0 : index
    %0 = vector.load %arg1[%c0, %c0_0] : memref<128x216xf32, #tpu.memory_space<vmem>>, vector<128x216xf32>
    %c0_1 = arith.constant 0 : index
    %c0_2 = arith.constant 0 : index
    %1 = vector.load %arg2[%c0_1, %c0_2] : memref<216x128xf32, #tpu.memory_space<vmem>>, vector<216x128xf32>
    %cst = arith.constant dense<0.000000e+00> : vector<128x128xf32>
    %2 = tpu.matmul %0, %1, %cst {dimension_numbers = #tpu.dot_dimension_numbers<[1], [0], [0], [1], [0, 0, 1, 1], [], []>} : vector<128x216xf32>, vector<216x128xf32>, vector<128x128xf32> -> vector<128x128xf32>
    %c0_3 = arith.constant 0 : index
    %c0_4 = arith.constant 0 : index
    %3 = vector.load %arg3[%c0_3, %c0_4] : memref<1x128xf32, #tpu.memory_space<vmem>>, vector<1x128xf32>
    %4 = vector.broadcast %3 : vector<1x128xf32> to vector<128x128xf32>
    %5 = arith.addf %2, %4 : vector<128x128xf32>
    %cst_5 = arith.constant 0.000000e+00 : f32
    %6 = vector.broadcast %cst_5 : f32 to vector<128x128xf32>
    %7 = arith.maximumf %5, %6 : vector<128x128xf32>
    %cst_6 = arith.constant 0.000000e+00 : f32
    %8 = vector.broadcast %cst_6 : f32 to vector<8x32xf32>
    %9 = vector.extract_strided_slice %7 {offsets = [0, 0], sizes = [8, 128], strides = [1, 1]} : vector<128x128xf32> to vector<8x128xf32>
    %c0_7 = arith.constant 0 : index
    %c0_8 = arith.constant 0 : index
    %10 = vector.load %arg4[%c0_7, %c0_8] : memref<2048x32xf32, #tpu.memory_space<vmem>>, vector<128x32xf32>
    %cst_9 = arith.constant dense<0.000000e+00> : vector<8x32xf32>
    %11 = tpu.matmul %9, %10, %cst_9 {dimension_numbers = #tpu.dot_dimension_numbers<[1], [0], [0], [1], [0, 0, 1, 1], [], []>} : vector<8x128xf32>, vector<128x32xf32>, vector<8x32xf32> -> vector<8x32xf32>
    %12 = arith.addf %8, %11 : vector<8x32xf32>
    %13 = vector.extract_strided_slice %7 {offsets = [8, 0], sizes = [8, 128], strides = [1, 1]} : vector<128x128xf32> to vector<8x128xf32>
    %c128 = arith.constant 128 : index
    %c0_10 = arith.constant 0 : index
    %14 = vector.load %arg4[%c128, %c0_10] : memref<2048x32xf32, #tpu.memory_space<vmem>>, vector<128x32xf32>
    %cst_11 = arith.constant dense<0.000000e+00> : vector<8x32xf32>
    %15 = tpu.matmul %13, %14, %cst_11 {dimension_numbers = #tpu.dot_dimension_numbers<[1], [0], [0], [1], [0, 0, 1, 1], [], []>} : vector<8x128xf32>, vector<128x32xf32>, vector<8x32xf32> -> vector<8x32xf32>
    %16 = arith.addf %12, %15 : vector<8x32xf32>
    %17 = vector.extract_strided_slice %7 {offsets = [16, 0], sizes = [8, 128], strides = [1, 1]} : vector<128x128xf32> to vector<8x128xf32>
    %c256 = arith.constant 256 : index
    %c0_12 = arith.constant 0 : index
    %18 = vector.load %arg4[%c256, %c0_12] : memref<2048x32xf32, #tpu.memory_space<vmem>>, vector<128x32xf32>
    %cst_13 = arith.constant dense<0.000000e+00> : vector<8x32xf32>
    %19 = tpu.matmul %17, %18, %cst_13 {dimension_numbers = #tpu.dot_dimension_numbers<[1], [0], [0], [1], [0, 0, 1, 1], [], []>} : vector<8x128xf32>, vector<128x32xf32>, vector<8x32xf32> -> vector<8x32xf32>
    %20 = arith.addf %16, %19 : vector<8x32xf32>
    %21 = vector.extract_strided_slice %7 {offsets = [24, 0], sizes = [8, 128], strides = [1, 1]} : vector<128x128xf32> to vector<8x128xf32>
    %c384 = arith.constant 384 : index
    %c0_14 = arith.constant 0 : index
    %22 = vector.load %arg4[%c384, %c0_14] : memref<2048x32xf32, #tpu.memory_space<vmem>>, vector<128x32xf32>
    %cst_15 = arith.constant dense<0.000000e+00> : vector<8x32xf32>
    %23 = tpu.matmul %21, %22, %cst_15 {dimension_numbers = #tpu.dot_dimension_numbers<[1], [0], [0], [1], [0, 0, 1, 1], [], []>} : vector<8x128xf32>, vector<128x32xf32>, vector<8x32xf32> -> vector<8x32xf32>
    %24 = arith.addf %20, %23 : vector<8x32xf32>
    %25 = vector.extract_strided_slice %7 {offsets = [32, 0], sizes = [8, 128], strides = [1, 1]} : vector<128x128xf32> to vector<8x128xf32>
    %c512 = arith.constant 512 : index
    %c0_16 = arith.constant 0 : index
    %26 = vector.load %arg4[%c512, %c0_16] : memref<2048x32xf32, #tpu.memory_space<vmem>>, vector<128x32xf32>
    %cst_17 = arith.constant dense<0.000000e+00> : vector<8x32xf32>
    %27 = tpu.matmul %25, %26, %cst_17 {dimension_numbers = #tpu.dot_dimension_numbers<[1], [0], [0], [1], [0, 0, 1, 1], [], []>} : vector<8x128xf32>, vector<128x32xf32>, vector<8x32xf32> -> vector<8x32xf32>
    %28 = arith.addf %24, %27 : vector<8x32xf32>
    %29 = vector.extract_strided_slice %7 {offsets = [40, 0], sizes = [8, 128], strides = [1, 1]} : vector<128x128xf32> to vector<8x128xf32>
    %c640 = arith.constant 640 : index
    %c0_18 = arith.constant 0 : index
    %30 = vector.load %arg4[%c640, %c0_18] : memref<2048x32xf32, #tpu.memory_space<vmem>>, vector<128x32xf32>
    %cst_19 = arith.constant dense<0.000000e+00> : vector<8x32xf32>
    %31 = tpu.matmul %29, %30, %cst_19 {dimension_numbers = #tpu.dot_dimension_numbers<[1], [0], [0], [1], [0, 0, 1, 1], [], []>} : vector<8x128xf32>, vector<128x32xf32>, vector<8x32xf32> -> vector<8x32xf32>
    %32 = arith.addf %28, %31 : vector<8x32xf32>
    %33 = vector.extract_strided_slice %7 {offsets = [48, 0], sizes = [8, 128], strides = [1, 1]} : vector<128x128xf32> to vector<8x128xf32>
    %c768 = arith.constant 768 : index
    %c0_20 = arith.constant 0 : index
    %34 = vector.load %arg4[%c768, %c0_20] : memref<2048x32xf32, #tpu.memory_space<vmem>>, vector<128x32xf32>
    %cst_21 = arith.constant dense<0.000000e+00> : vector<8x32xf32>
    %35 = tpu.matmul %33, %34, %cst_21 {dimension_numbers = #tpu.dot_dimension_numbers<[1], [0], [0], [1], [0, 0, 1, 1], [], []>} : vector<8x128xf32>, vector<128x32xf32>, vector<8x32xf32> -> vector<8x32xf32>
    %36 = arith.addf %32, %35 : vector<8x32xf32>
    %37 = vector.extract_strided_slice %7 {offsets = [56, 0], sizes = [8, 128], strides = [1, 1]} : vector<128x128xf32> to vector<8x128xf32>
    %c896 = arith.constant 896 : index
    %c0_22 = arith.constant 0 : index
    %38 = vector.load %arg4[%c896, %c0_22] : memref<2048x32xf32, #tpu.memory_space<vmem>>, vector<128x32xf32>
    %cst_23 = arith.constant dense<0.000000e+00> : vector<8x32xf32>
    %39 = tpu.matmul %37, %38, %cst_23 {dimension_numbers = #tpu.dot_dimension_numbers<[1], [0], [0], [1], [0, 0, 1, 1], [], []>} : vector<8x128xf32>, vector<128x32xf32>, vector<8x32xf32> -> vector<8x32xf32>
    %40 = arith.addf %36, %39 : vector<8x32xf32>
    %41 = vector.extract_strided_slice %7 {offsets = [64, 0], sizes = [8, 128], strides = [1, 1]} : vector<128x128xf32> to vector<8x128xf32>
    %c1024 = arith.constant 1024 : index
    %c0_24 = arith.constant 0 : index
    %42 = vector.load %arg4[%c1024, %c0_24] : memref<2048x32xf32, #tpu.memory_space<vmem>>, vector<128x32xf32>
    %cst_25 = arith.constant dense<0.000000e+00> : vector<8x32xf32>
    %43 = tpu.matmul %41, %42, %cst_25 {dimension_numbers = #tpu.dot_dimension_numbers<[1], [0], [0], [1], [0, 0, 1, 1], [], []>} : vector<8x128xf32>, vector<128x32xf32>, vector<8x32xf32> -> vector<8x32xf32>
    %44 = arith.addf %40, %43 : vector<8x32xf32>
    %45 = vector.extract_strided_slice %7 {offsets = [72, 0], sizes = [8, 128], strides = [1, 1]} : vector<128x128xf32> to vector<8x128xf32>
    %c1152 = arith.constant 1152 : index
    %c0_26 = arith.constant 0 : index
    %46 = vector.load %arg4[%c1152, %c0_26] : memref<2048x32xf32, #tpu.memory_space<vmem>>, vector<128x32xf32>
    %cst_27 = arith.constant dense<0.000000e+00> : vector<8x32xf32>
    %47 = tpu.matmul %45, %46, %cst_27 {dimension_numbers = #tpu.dot_dimension_numbers<[1], [0], [0], [1], [0, 0, 1, 1], [], []>} : vector<8x128xf32>, vector<128x32xf32>, vector<8x32xf32> -> vector<8x32xf32>
    %48 = arith.addf %44, %47 : vector<8x32xf32>
    %49 = vector.extract_strided_slice %7 {offsets = [80, 0], sizes = [8, 128], strides = [1, 1]} : vector<128x128xf32> to vector<8x128xf32>
    %c1280 = arith.constant 1280 : index
    %c0_28 = arith.constant 0 : index
    %50 = vector.load %arg4[%c1280, %c0_28] : memref<2048x32xf32, #tpu.memory_space<vmem>>, vector<128x32xf32>
    %cst_29 = arith.constant dense<0.000000e+00> : vector<8x32xf32>
    %51 = tpu.matmul %49, %50, %cst_29 {dimension_numbers = #tpu.dot_dimension_numbers<[1], [0], [0], [1], [0, 0, 1, 1], [], []>} : vector<8x128xf32>, vector<128x32xf32>, vector<8x32xf32> -> vector<8x32xf32>
    %52 = arith.addf %48, %51 : vector<8x32xf32>
    %53 = vector.extract_strided_slice %7 {offsets = [88, 0], sizes = [8, 128], strides = [1, 1]} : vector<128x128xf32> to vector<8x128xf32>
    %c1408 = arith.constant 1408 : index
    %c0_30 = arith.constant 0 : index
    %54 = vector.load %arg4[%c1408, %c0_30] : memref<2048x32xf32, #tpu.memory_space<vmem>>, vector<128x32xf32>
    %cst_31 = arith.constant dense<0.000000e+00> : vector<8x32xf32>
    %55 = tpu.matmul %53, %54, %cst_31 {dimension_numbers = #tpu.dot_dimension_numbers<[1], [0], [0], [1], [0, 0, 1, 1], [], []>} : vector<8x128xf32>, vector<128x32xf32>, vector<8x32xf32> -> vector<8x32xf32>
    %56 = arith.addf %52, %55 : vector<8x32xf32>
    %57 = vector.extract_strided_slice %7 {offsets = [96, 0], sizes = [8, 128], strides = [1, 1]} : vector<128x128xf32> to vector<8x128xf32>
    %c1536 = arith.constant 1536 : index
    %c0_32 = arith.constant 0 : index
    %58 = vector.load %arg4[%c1536, %c0_32] : memref<2048x32xf32, #tpu.memory_space<vmem>>, vector<128x32xf32>
    %cst_33 = arith.constant dense<0.000000e+00> : vector<8x32xf32>
    %59 = tpu.matmul %57, %58, %cst_33 {dimension_numbers = #tpu.dot_dimension_numbers<[1], [0], [0], [1], [0, 0, 1, 1], [], []>} : vector<8x128xf32>, vector<128x32xf32>, vector<8x32xf32> -> vector<8x32xf32>
    %60 = arith.addf %56, %59 : vector<8x32xf32>
    %61 = vector.extract_strided_slice %7 {offsets = [104, 0], sizes = [8, 128], strides = [1, 1]} : vector<128x128xf32> to vector<8x128xf32>
    %c1664 = arith.constant 1664 : index
    %c0_34 = arith.constant 0 : index
    %62 = vector.load %arg4[%c1664, %c0_34] : memref<2048x32xf32, #tpu.memory_space<vmem>>, vector<128x32xf32>
    %cst_35 = arith.constant dense<0.000000e+00> : vector<8x32xf32>
    %63 = tpu.matmul %61, %62, %cst_35 {dimension_numbers = #tpu.dot_dimension_numbers<[1], [0], [0], [1], [0, 0, 1, 1], [], []>} : vector<8x128xf32>, vector<128x32xf32>, vector<8x32xf32> -> vector<8x32xf32>
    %64 = arith.addf %60, %63 : vector<8x32xf32>
    %65 = vector.extract_strided_slice %7 {offsets = [112, 0], sizes = [8, 128], strides = [1, 1]} : vector<128x128xf32> to vector<8x128xf32>
    %c1792 = arith.constant 1792 : index
    %c0_36 = arith.constant 0 : index
    %66 = vector.load %arg4[%c1792, %c0_36] : memref<2048x32xf32, #tpu.memory_space<vmem>>, vector<128x32xf32>
    %cst_37 = arith.constant dense<0.000000e+00> : vector<8x32xf32>
    %67 = tpu.matmul %65, %66, %cst_37 {dimension_numbers = #tpu.dot_dimension_numbers<[1], [0], [0], [1], [0, 0, 1, 1], [], []>} : vector<8x128xf32>, vector<128x32xf32>, vector<8x32xf32> -> vector<8x32xf32>
    %68 = arith.addf %64, %67 : vector<8x32xf32>
    %69 = vector.extract_strided_slice %7 {offsets = [120, 0], sizes = [8, 128], strides = [1, 1]} : vector<128x128xf32> to vector<8x128xf32>
    %c1920 = arith.constant 1920 : index
    %c0_38 = arith.constant 0 : index
    %70 = vector.load %arg4[%c1920, %c0_38] : memref<2048x32xf32, #tpu.memory_space<vmem>>, vector<128x32xf32>
    %cst_39 = arith.constant dense<0.000000e+00> : vector<8x32xf32>
    %71 = tpu.matmul %69, %70, %cst_39 {dimension_numbers = #tpu.dot_dimension_numbers<[1], [0], [0], [1], [0, 0, 1, 1], [], []>} : vector<8x128xf32>, vector<128x32xf32>, vector<8x32xf32> -> vector<8x32xf32>
    %72 = arith.addf %68, %71 : vector<8x32xf32>
    %c0_40 = arith.constant 0 : index
    %c0_41 = arith.constant 0 : index
    %73 = vector.load %arg5[%c0_40, %c0_41] : memref<1x32xf32, #tpu.memory_space<vmem>>, vector<1x32xf32>
    %74 = vector.broadcast %73 : vector<1x32xf32> to vector<8x32xf32>
    %75 = arith.addf %72, %74 : vector<8x32xf32>
    %cst_42 = arith.constant 0.000000e+00 : f32
    %76 = vector.broadcast %cst_42 : f32 to vector<8x32xf32>
    %77 = arith.maximumf %75, %76 : vector<8x32xf32>
    %c0_43 = arith.constant 0 : index
    %c0_44 = arith.constant 0 : index
    %78 = vector.load %arg6[%c0_43, %c0_44] : memref<32x6xf32, #tpu.memory_space<vmem>>, vector<32x6xf32>
    %cst_45 = arith.constant dense<0.000000e+00> : vector<8x6xf32>
    %79 = tpu.matmul %77, %78, %cst_45 {dimension_numbers = #tpu.dot_dimension_numbers<[1], [0], [0], [1], [0, 0, 1, 1], [], []>} : vector<8x32xf32>, vector<32x6xf32>, vector<8x6xf32> -> vector<8x6xf32>
    %c0_46 = arith.constant 0 : index
    %c0_47 = arith.constant 0 : index
    %80 = vector.load %arg7[%c0_46, %c0_47] : memref<1x6xf32, #tpu.memory_space<vmem>>, vector<1x6xf32>
    %81 = vector.broadcast %80 : vector<1x6xf32> to vector<8x6xf32>
    %82 = arith.addf %79, %81 : vector<8x6xf32>
    %c0_48 = arith.constant 0 : index
    %c0_49 = arith.constant 0 : index
    %83 = vector.load %arg8[%c0_48, %c0_49] : memref<8x6xf32, #tpu.memory_space<vmem>>, vector<8x6xf32>
    tpu.vector_store %arg8[%c0_48, %c0_49], %82 {strides = array<i32>} : memref<8x6xf32, #tpu.memory_space<vmem>>, vector<8x6xf32>,
    return
  }
  func.func @transform_0(%arg0: i32) -> (i32, i32) {
    %c0_i32 = arith.constant 0 : i32
    %c0_i32_0 = arith.constant 0 : i32
    %c0_i32_1 = arith.constant 0 : i32
    return %c0_i32, %c0_i32_0 : i32, i32
  }
  func.func @transform_1(%arg0: i32) -> (i32, i32) {
    %c0_i32 = arith.constant 0 : i32
    %c0_i32_0 = arith.constant 0 : i32
    %c0_i32_1 = arith.constant 0 : i32
    return %c0_i32, %c0_i32_0 : i32, i32
  }
  func.func @transform_2(%arg0: i32) -> (i32, i32) {
    %c0_i32 = arith.constant 0 : i32
    %c0_i32_0 = arith.constant 0 : i32
    %c0_i32_1 = arith.constant 0 : i32
    return %c0_i32, %c0_i32_0 : i32, i32
  }
  func.func @transform_3(%arg0: i32) -> (i32, i32) {
    %c0_i32 = arith.constant 0 : i32
    %c0_i32_0 = arith.constant 0 : i32
    %c0_i32_1 = arith.constant 0 : i32
    return %c0_i32, %c0_i32_0 : i32, i32
  }
  func.func @transform_4(%arg0: i32) -> (i32, i32) {
    %c0_i32 = arith.constant 0 : i32
    %c0_i32_0 = arith.constant 0 : i32
    %c0_i32_1 = arith.constant 0 : i32
    return %c0_i32, %c0_i32_0 : i32, i32
  }
  func.func @transform_5(%arg0: i32) -> (i32, i32) {
    %c0_i32 = arith.constant 0 : i32
    %c0_i32_0 = arith.constant 0 : i32
    %c0_i32_1 = arith.constant 0 : i32
    return %c0_i32, %c0_i32_0 : i32, i32
  }
  func.func @transform_6(%arg0: i32) -> (i32, i32) {
    %c0_i32 = arith.constant 0 : i32
    %c0_i32_0 = arith.constant 0 : i32
    %c0_i32_1 = arith.constant 0 : i32
    return %c0_i32, %c0_i32_0 : i32, i32
  }
  func.func @transform_7(%arg0: i32) -> (i32, i32) {
    %c0_i32 = arith.constant 0 : i32
    %c0_i32_0 = arith.constant 0 : i32
    %c0_i32_1 = arith.constant 0 : i32
    return %c0_i32, %c0_i32_0 : i32, i32
  }
}

</mosaic_0001>

<bundles_post_ra>
// kernel: full_model_forward.1
= control target key start
LH: loop header
LB: loop body
LE: loop exit
PB: predicated region body
PF: predicated region fallthrough
CT: control target
= control target key end

     0   :  { %vm89_vm0 = vcmask 719872   ;;  %vm888_vm1 = vcmask 261120   ;;  %vm912_vm2 = vcmask 48128   ;;  %s1996_s1 = inlined_call_operand.vmem [shape: f32[216,128], index: 1, kind: input, shape index: {}]   ;;  %s1997_s2 = inlined_call_operand.vmem [shape: f32[1,128], index: 2, kind: input, shape index: {}]   ;;  %s1998_s0 = inlined_call_operand.vmem [shape: f32[128,216], index: 0, kind: input, shape index: {}]   ;;  %s1999_s3 = inlined_call_operand.vmem [shape: f32[2048,32], index: 3, kind: input, shape index: {}]   ;;  %s2000_s4 = inlined_call_operand.vmem [shape: f32[1,32], index: 4, kind: input, shape index: {}]   ;;  %s2001_s6 = inlined_call_operand.vmem [shape: f32[1,6], index: 6, kind: input, shape index: {}]   ;;  %s2002_s5 = inlined_call_operand.vmem [shape: f32[32,6], index: 5, kind: input, shape index: {}]   ;;  %s2003_s7 = inlined_call_operand.vmem [shape: f32[8,6], index: 7, kind: output, shape index: {}]  }
   0x1   :  { %v73_v0 = vld [vmem:[%s1996_s1 + $0x78] sm:$0xff]  ;;  %v72_v1 = vld [vmem:[%s1996_s1 + $0x70] sm:$0xff]  ;;  %v71_v2 = vld [vmem:[%s1996_s1 + $0x68] sm:$0xff] }
   0x2   :  { %138 = vmatpush.msra.mxu0 %v73_v0  ;;  %v84_v3 = vld [vmem:[%s1996_s1 + $0xd0] sm:$0xff]  ;;  %v83_v4 = vld [vmem:[%s1996_s1 + $0xc8] sm:$0xff]  ;;  %v70_v5 = vld [vmem:[%s1996_s1 + $0x60] sm:$0xff] }
   0x3   :  { %208 = vmatpush.msra.mxu1 %v84_v3  ;;  %v82_v6 = vld [vmem:[%s1996_s1 + $0xc0] sm:$0xff]  ;;  %v69_v7 = vld [vmem:[%s1996_s1 + $0x58] sm:$0xff]  ;;  %v68_v9 = vld [vmem:[%s1996_s1 + $0x50] sm:$0xff] }
   0x4   :  { %139 = vmatpush.msra.mxu0 %v72_v1  ;;  %v81_v8 = vld [vmem:[%s1996_s1 + $0xb8] sm:$0xff]  ;;  %v80_v10 = vld [vmem:[%s1996_s1 + $0xb0] sm:$0xff]  ;;  %v67_v11 = vld [vmem:[%s1996_s1 + $0x48] sm:$0xff] }
   0x5   :  { %209 = vmatpush.msra.mxu1 %v83_v4  ;;  %v79_v12 = vld [vmem:[%s1996_s1 + $0xa8] sm:$0xff]  ;;  %v66_v13 = vld [vmem:[%s1996_s1 + $0x40] sm:$0xff]  ;;  %v65_v15 = vld [vmem:[%s1996_s1 + $0x38] sm:$0xff] }
   0x6   :  { %140 = vmatpush.msra.mxu0 %v71_v2  ;;  %v78_v14 = vld [vmem:[%s1996_s1 + $0xa0] sm:$0xff]  ;;  %v77_v16 = vld [vmem:[%s1996_s1 + $0x98] sm:$0xff]  ;;  %v64_v17 = vld [vmem:[%s1996_s1 + $0x30] sm:$0xff] }
   0x7   :  { %210 = vmatpush.msra.mxu1 %v82_v6  ;;  %v76_v18 = vld [vmem:[%s1996_s1 + $0x90] sm:$0xff]  ;;  %v63_v19 = vld [vmem:[%s1996_s1 + $0x28] sm:$0xff]  ;;  %v62_v21 = vld [vmem:[%s1996_s1 + $0x20] sm:$0xff] }
   0x8   :  { %141 = vmatpush.msra.mxu0 %v70_v5  ;;  %v75_v20 = vld [vmem:[%s1996_s1 + $0x88] sm:$0xff]  ;;  %v74_v22 = vld [vmem:[%s1996_s1 + $0x80] sm:$0xff]  ;;  %v61_v24 = vld [vmem:[%s1996_s1 + $0x18] sm:$0xff] }
   0x9   :  { %211 = vmatpush.msra.mxu1 %v81_v8  ;;  %v27_v23 = vld [vmem:[%s1998_s0 + $0x8] sm:$0xff]  ;;  %v60_v25 = vld [vmem:[%s1996_s1 + $0x10] sm:$0xff]  ;;  %v58_v27 = vld [vmem:[%s1996_s1] sm:$0xff] }
   0xa   :  { %142 = vmatpush.msra.mxu0 %v69_v7  ;;  %v59_v26 = vld [vmem:[%s1996_s1 + $0x8] sm:$0xff]  ;;  %v26_v28 = vld [vmem:[%s1998_s0] sm:$0xff]  ;;  %v29_v29 = vld [vmem:[%s1998_s0 + $0x18] sm:$0xff] }
   0xb   :  { %212 = vmatpush.msra.mxu1 %v80_v10  ;;  %v28_v30 = vld [vmem:[%s1998_s0 + $0x10] sm:$0xff]  ;;  %v31_v31 = vld [vmem:[%s1998_s0 + $0x28] sm:$0xff]  ;;  %v30_v32 = vld [vmem:[%s1998_s0 + $0x20] sm:$0xff] }
   0xc   :  { %143 = vmatpush.msra.mxu0 %v68_v9  ;;  %v33_v33 = vld [vmem:[%s1998_s0 + $0x38] sm:$0xff]  ;;  %v32_v34 = vld [vmem:[%s1998_s0 + $0x30] sm:$0xff]  ;;  %v35_v35 = vld [vmem:[%s1998_s0 + $0x48] sm:$0xff] }
   0xd   :  { %213 = vmatpush.msra.mxu1 %v79_v12  ;;  %v34_v36 = vld [vmem:[%s1998_s0 + $0x40] sm:$0xff]  ;;  %v37_v37 = vld [vmem:[%s1998_s0 + $0x58] sm:$0xff]  ;;  %v314_v40 = vld [vmem:[%s1999_s3 + $0xf0] sm:$0xff] }
   0xe   :  { %144 = vmatpush.msra.mxu0 %v67_v11  ;;  %v315_v38 = vld [vmem:[%s1999_s3 + $0xf8] sm:$0xff]  ;;  %v298_v41 = vld [vmem:[%s1999_s3 + $0x70] sm:$0xff]  ;;  %v39_v43 = vld [vmem:[%s1998_s0 + $0x68] sm:$0xff] }
   0xf   :  { %214 = vmatpush.msra.mxu1 %v78_v14  ;;  %v299_v39 = vld [vmem:[%s1999_s3 + $0x78] sm:$0xff]  ;;  %316 = vmatpush.msra.mxu2 %v315_v38  ;;  %v36_v42 = vld [vmem:[%s1998_s0 + $0x50] sm:$0xff]  ;;  %v313_v44 = vld [vmem:[%s1999_s3 + $0xe8] sm:$0xff] }
  0x10   :  { %145 = vmatpush.msra.mxu0 %v66_v13  ;;  %336 = vmatpush.msra.mxu3 %v299_v39  ;;  %v297_v45 = vld [vmem:[%s1999_s3 + $0x68] sm:$0xff]  ;;  %v312_v46 = vld [vmem:[%s1999_s3 + $0xe0] sm:$0xff]  ;;  %v311_v48 = vld [vmem:[%s1999_s3 + $0xd8] sm:$0xff] }
  0x11   :  { %215 = vmatpush.msra.mxu1 %v77_v16  ;;  %317 = vmatpush.msra.mxu2 %v314_v40  ;;  %v296_v47 = vld [vmem:[%s1999_s3 + $0x60] sm:$0xff]  ;;  %v295_v49 = vld [vmem:[%s1999_s3 + $0x58] sm:$0xff]  ;;  %v310_v50 = vld [vmem:[%s1999_s3 + $0xd0] sm:$0xff] }
  0x12   :  { %146 = vmatpush.msra.mxu0 %v65_v15  ;;  %337 = vmatpush.msra.mxu3 %v298_v41  ;;  %v294_v51 = vld [vmem:[%s1999_s3 + $0x50] sm:$0xff]  ;;  %v38_v52 = vld [vmem:[%s1998_s0 + $0x60] sm:$0xff]  ;;  %v41_v53 = vld [vmem:[%s1998_s0 + $0x78] sm:$0xff] }
  0x13   :  { %216 = vmatpush.msra.mxu1 %v76_v18  ;;  %318 = vmatpush.msra.mxu2 %v313_v44  ;;  %v309_v54 = vld [vmem:[%s1999_s3 + $0xc8] sm:$0xff]  ;;  %v308_v56 = vld [vmem:[%s1999_s3 + $0xc0] sm:$0xff]  ;;  %v307_v58 = vld [vmem:[%s1999_s3 + $0xb8] sm:$0xff] }
  0x14   :  { %147 = vmatpush.msra.mxu0 %v64_v17  ;;  %338 = vmatpush.msra.mxu3 %v297_v45  ;;  %v293_v55 = vld [vmem:[%s1999_s3 + $0x48] sm:$0xff]  ;;  %v292_v57 = vld [vmem:[%s1999_s3 + $0x40] sm:$0xff]  ;;  %v291_v59 = vld [vmem:[%s1999_s3 + $0x38] sm:$0xff] }
  0x15   :  { %217 = vmatpush.msra.mxu1 %v75_v20  ;;  %319 = vmatpush.msra.mxu2 %v312_v46  ;;  %v306_v60 = vld [vmem:[%s1999_s3 + $0xb0] sm:$0xff]  ;;  %v43_v63 = vld [vmem:[%s1998_s0 + $0x88] sm:$0xff]  ;;  %v304_v2 = vld [vmem:[%s1999_s3 + $0xa0] sm:$0xff] }
  0x16   :  { %148 = vmatpush.msra.mxu0 %v63_v19  ;;  %339 = vmatpush.msra.mxu3 %v296_v47  ;;  %v290_v61 = vld [vmem:[%s1999_s3 + $0x30] sm:$0xff]  ;;  %v305_v0 = vld [vmem:[%s1999_s3 + $0xa8] sm:$0xff]  ;;  %v288_v3 = vld [vmem:[%s1999_s3 + $0x20] sm:$0xff] }
  0x17   :  { %218 = vmatpush.msra.mxu1 %v74_v22  ;;  %320 = vmatpush.msra.mxu2 %v311_v48  ;;  %v40_v62 = vld [vmem:[%s1998_s0 + $0x70] sm:$0xff]  ;;  %v289_v1 = vld [vmem:[%s1999_s3 + $0x28] sm:$0xff]  ;;  %v303_v4 = vld [vmem:[%s1999_s3 + $0x98] sm:$0xff] }
  0x18   :  { %149 = vmatpush.msra.mxu0 %v62_v21  ;;  %918 = vmatmul.msk.f32.vlgmr.msra.gmra.mxu1 %vm89_vm0, %v27_v23  ;;  %v287_v5 = vld [vmem:[%s1999_s3 + $0x18] sm:$0xff]  ;;  %v302_v6 = vld [vmem:[%s1999_s3 + $0x90] sm:$0xff]  ;;  %v42_v8 = vld [vmem:[%s1998_s0 + $0x80] sm:$0xff] }
  0x19   :  { %340 = vmatpush.msra.mxu3 %v295_v49  ;;  %321 = vmatpush.msra.mxu2 %v310_v50  ;;  %v286_v7 = vld [vmem:[%s1999_s3 + $0x10] sm:$0xff]  ;;  %v45_v9 = vld [vmem:[%s1998_s0 + $0x98] sm:$0xff]  ;;  %v301_v10 = vld [vmem:[%s1999_s3 + $0x88] sm:$0xff] }
  0x1a   :  { %150 = vmatpush.msra.mxu0 %v61_v24  ;;  %v285_v11 = vld [vmem:[%s1999_s3 + $0x8] sm:$0xff]  ;;  %v300_v12 = vld [vmem:[%s1999_s3 + $0x80] sm:$0xff]  ;;  %v371_v14 = vld [vmem:[%s1999_s3 + $0x178] sm:$0xff] }
  0x1b   :  { %341 = vmatpush.msra.mxu3 %v294_v51  ;;  %322 = vmatpush.msra.mxu2 %v309_v54  ;;  %v284_v13 = vld [vmem:[%s1999_s3] sm:$0xff]  ;;  %v408_v15 = vld [vmem:[%s1999_s3 + $0x1f8] sm:$0xff]  ;;  %v370_v16 = vld [vmem:[%s1999_s3 + $0x170] sm:$0xff] }
  0x1c   :  { %151 = vmatpush.msra.mxu0 %v60_v25  ;;  %v407_v17 = vld [vmem:[%s1999_s3 + $0x1f0] sm:$0xff]  ;;  %v47_v19 = vld [vmem:[%s1998_s0 + $0xa8] sm:$0xff]  ;;  %v368_v22 = vld [vmem:[%s1999_s3 + $0x160] sm:$0xff] }
  0x1d   :  { %342 = vmatpush.msra.mxu3 %v293_v55  ;;  %323 = vmatpush.msra.mxu2 %v308_v56  ;;  %v44_v18 = vld [vmem:[%s1998_s0 + $0x90] sm:$0xff]  ;;  %v369_v20 = vld [vmem:[%s1999_s3 + $0x168] sm:$0xff]  ;;  %v405_v23 = vld [vmem:[%s1999_s3 + $0x1e0] sm:$0xff] }
  0x1e   :  { %152 = vmatpush.msra.mxu0 %v59_v26  ;;  %v406_v21 = vld [vmem:[%s1999_s3 + $0x1e8] sm:$0xff]  ;;  %v367_v24 = vld [vmem:[%s1999_s3 + $0x158] sm:$0xff]  ;;  %v366_v26 = vld [vmem:[%s1999_s3 + $0x150] sm:$0xff] }
  0x1f   :  { %343 = vmatpush.msra.mxu3 %v292_v57  ;;  %324 = vmatpush.msra.mxu2 %v307_v58  ;;  %v404_v25 = vld [vmem:[%s1999_s3 + $0x1d8] sm:$0xff]  ;;  %v50_v38 = vld [vmem:[%s1998_s0 + $0xc0] sm:$0xff]  ;;  %v362_v40 = vld [vmem:[%s1999_s3 + $0x130] sm:$0xff] }
  0x20   :  { %153 = vmatpush.msra.mxu0 %v58_v27  ;;  %919 = vmatmul.msk.f32.gmra.mxu1 %vm89_vm0, %v29_v29  ;;  %v403_v27 = vld [vmem:[%s1999_s3 + $0x1d0] sm:$0xff]  ;;  %v49_v29 = vld [vmem:[%s1998_s0 + $0xb8] sm:$0xff]  ;;  %v360_v45 = vld [vmem:[%s1999_s3 + $0x120] sm:$0xff] }
  0x21   :  { %154 = vmatmul.f32.vlgmr.msra.gmra.mxu0 %v26_v28  ;;  %344 = vmatpush.msra.mxu3 %v291_v59  ;;  %v46_v28 = vld [vmem:[%s1998_s0 + $0xa0] sm:$0xff]  ;;  %v53_v39 = vld [vmem:[%s1998_s0 + $0xd8] sm:$0xff]  ;;  %v399_v41 = vld [vmem:[%s1999_s3 + $0x1b0] sm:$0xff] }
  0x22   :  { %325 = vmatpush.msra.mxu2 %v306_v60  ;;  %v593_v44 = vld [vmem:[%s1999_s3 + $0x478] sm:$0xff]  ;;  %v397_v46 = vld [vmem:[%s1999_s3 + $0x1a0] sm:$0xff]  ;;  %v52_v50 = vld [vmem:[%s1998_s0 + $0xd0] sm:$0xff] }
  0x23   :  { %345 = vmatpush.msra.mxu3 %v290_v61  ;;  %594 = vmatpush.msrb.mxu1 %v593_v44  ;;  %v630_v47 = vld [vmem:[%s1999_s3 + $0x4f8] sm:$0xff]  ;;  %v55_v51 = vld [vmem:[%s1998_s0 + $0xe8] sm:$0xff]  ;;  %v592_v56 = vld [vmem:[%s1999_s3 + $0x470] sm:$0xff] }
  0x24   :  { %326 = vmatpush.msra.mxu2 %v305_v0  ;;  %v359_v48 = vld [vmem:[%s1999_s3 + $0x118] sm:$0xff]  ;;  %631 = vmatpush.msrb.mxu0 %v630_v47  ;;  %v357_v54 = vld [vmem:[%s1999_s3 + $0x108] sm:$0xff]  ;;  %v356_v57 = vld [vmem:[%s1999_s3 + $0x100] sm:$0xff] }
  0x25   :  { %346 = vmatpush.msra.mxu3 %v289_v1  ;;  %v396_v49 = vld [vmem:[%s1999_s3 + $0x198] sm:$0xff]  ;;  %v394_v55 = vld [vmem:[%s1999_s3 + $0x188] sm:$0xff]  ;;  %v393_v58 = vld [vmem:[%s1999_s3 + $0x180] sm:$0xff]  ;;  %595 = vmatpush.msrb.mxu1 %v592_v56 }
  0x26   :  { %327 = vmatpush.msra.mxu2 %v304_v2  ;;  %v54_v59 = vld [vmem:[%s1998_s0 + $0xe0] sm:$0xff]  ;;  %v57_v60 = vld [vmem:[%s1998_s0 + $0xf8] sm:$0xff]  ;;  %v629_v61 = vld [vmem:[%s1999_s3 + $0x4f0] sm:$0xff] }
  0x27   :  { %347 = vmatpush.msra.mxu3 %v288_v3  ;;  %632 = vmatpush.msrb.mxu0 %v629_v61  ;;  %v56_v0 = vld [vmem:[%s1998_s0 + $0xf0] sm:$0xff]  ;;  %v628_v1 = vld [vmem:[%s1999_s3 + $0x4e8] sm:$0xff]  ;;  %v1384_v2 = vld [vmem:[%s1997_s2] ss:$0 sm:$0xff] }
  0x28   :  { %920 = vmatmul.msk.f32.gmra.mxu1 %vm89_vm0, %v31_v31  ;;  %328 = vmatpush.msra.mxu2 %v303_v4  ;;  %v402_v31 = vld [vmem:[%s1999_s3 + $0x1c8] sm:$0xff]  ;;  %v590_v3 = vld [vmem:[%s1999_s3 + $0x460] sm:$0xff] }
  0x29   :  { %157 = vmatmul.f32.gmra.mxu0 %v28_v30  ;;  %348 = vmatpush.msra.mxu3 %v287_v5  ;;  %v365_v30 = vld [vmem:[%s1999_s3 + $0x148] sm:$0xff] }
  0x2a   :  { %329 = vmatpush.msra.mxu2 %v302_v6  ;;  %633 = vmatpush.msrb.mxu0 %v628_v1  ;;  %v627_v6 = vld [vmem:[%s1999_s3 + $0x4e0] sm:$0xff]  ;;  %v433_v1 = vld [vmem:[%s1999_s3 + $0x218] sm:$0xff] }
  0x2b   :  { %349 = vmatpush.msra.mxu3 %v286_v7 }
  0x2c   :  { %330 = vmatpush.msra.mxu2 %v301_v10  ;;  %634 = vmatpush.msrb.mxu0 %v627_v6  ;;  %v482_v10 = vld [vmem:[%s1999_s3 + $0x2f8] sm:$0xff]  ;;  %v432_v6 = vld [vmem:[%s1999_s3 + $0x210] sm:$0xff] }
  0x2d   :  { %350 = vmatpush.msra.mxu3 %v285_v11  ;;  %v589_v11 = vld [vmem:[%s1999_s3 + $0x458] sm:$0xff] }
  0x2e   :  { %331 = vmatpush.msra.mxu2 %v300_v12  ;;  %v481_v12 = vld [vmem:[%s1999_s3 + $0x2f0] sm:$0xff] }
  0x2f   :  { %351 = vmatpush.msra.mxu3 %v284_v13 }
  0x30   :  { %921 = vmatmul.msk.f32.gmra.mxu1 %vm89_vm0, %v33_v33  ;;  %372 = vmatpush.msrb.mxu2 %v371_v14  ;;  %v401_v33 = vld [vmem:[%s1999_s3 + $0x1c0] sm:$0xff] }
  0x31   :  { %160 = vmatmul.f32.gmra.mxu0 %v30_v32  ;;  %409 = vmatpush.msrb.mxu3 %v408_v15  ;;  %v364_v32 = vld [vmem:[%s1999_s3 + $0x140] sm:$0xff]  ;;  %v626_v15 = vld [vmem:[%s1999_s3 + $0x4d8] sm:$0xff] }
  0x32   :  { %373 = vmatpush.msrb.mxu2 %v370_v16  ;;  %635 = vmatpush.msrb.mxu0 %v626_v15 }
  0x33   :  { %410 = vmatpush.msrb.mxu3 %v407_v17  ;;  %v480_v17 = vld [vmem:[%s1999_s3 + $0x2e8] sm:$0xff] }
  0x34   :  { %374 = vmatpush.msrb.mxu2 %v369_v20 }
  0x35   :  { %411 = vmatpush.msrb.mxu3 %v406_v21  ;;  %v445_v21 = vld [vmem:[%s1999_s3 + $0x278] sm:$0xff] }
  0x36   :  { %375 = vmatpush.msrb.mxu2 %v368_v22  ;;  %v478_v22 = vld [vmem:[%s1999_s3 + $0x2d8] sm:$0xff] }
  0x37   :  { %412 = vmatpush.msrb.mxu3 %v405_v23  ;;  %v588_v23 = vld [vmem:[%s1999_s3 + $0x450] sm:$0xff] }
  0x38   :  { %922 = vmatmul.msk.f32.gmra.mxu1 %vm89_vm0, %v35_v35  ;;  %376 = vmatpush.msrb.mxu2 %v367_v24  ;;  %v51_v35 = vld [vmem:[%s1998_s0 + $0xc8] sm:$0xff]  ;;  %v444_v24 = vld [vmem:[%s1999_s3 + $0x270] sm:$0xff] }
  0x39   :  { %163 = vmatmul.f32.gmra.mxu0 %v32_v34  ;;  %413 = vmatpush.msrb.mxu3 %v404_v25  ;;  %v48_v34 = vld [vmem:[%s1998_s0 + $0xb0] sm:$0xff] }
  0x3a   :  { %377 = vmatpush.msrb.mxu2 %v366_v26  ;;  %v477_v25 = vld [vmem:[%s1999_s3 + $0x2d0] sm:$0xff] }
  0x3b   :  { %414 = vmatpush.msrb.mxu3 %v403_v27 }
  0x3c   :  { %378 = vmatpush.msrb.mxu2 %v365_v30  ;;  %v443_v30 = vld [vmem:[%s1999_s3 + $0x268] sm:$0xff] }
  0x3d   :  { %415 = vmatpush.msrb.mxu3 %v402_v31  ;;  %v476_v31 = vld [vmem:[%s1999_s3 + $0x2c8] sm:$0xff] }
  0x3e   :  { %379 = vmatpush.msrb.mxu2 %v364_v32 }
  0x3f   :  { %416 = vmatpush.msrb.mxu3 %v401_v33  ;;  %v442_v33 = vld [vmem:[%s1999_s3 + $0x260] sm:$0xff] }
  0x40   :  { %923 = vmatmul.msk.f32.gmra.mxu1 %vm89_vm0, %v37_v37  ;;  %v400_v37 = vld [vmem:[%s1999_s3 + $0x1b8] sm:$0xff] }
  0x41   :  { %166 = vmatmul.f32.gmra.mxu0 %v34_v36  ;;  %v363_v36 = vld [vmem:[%s1999_s3 + $0x138] sm:$0xff]  ;;  %417 = vmatpush.msrb.mxu3 %v400_v37 }
  0x42   :  { %380 = vmatpush.msrb.mxu2 %v363_v36  ;;  %v441_v36 = vld [vmem:[%s1999_s3 + $0x258] sm:$0xff] }
  0x43   :  { %418 = vmatpush.msrb.mxu3 %v399_v41  ;;  %v474_v37 = vld [vmem:[%s1999_s3 + $0x2b8] sm:$0xff] }
  0x44   :  { %381 = vmatpush.msrb.mxu2 %v362_v40  ;;  %v473_v40 = vld [vmem:[%s1999_s3 + $0x2b0] sm:$0xff] }
  0x48   :  { %924 = vmatmul.msk.f32.gmra.mxu1 %vm89_vm0, %v39_v43  ;;  %v398_v43 = vld [vmem:[%s1999_s3 + $0x1a8] sm:$0xff] }
  0x49   :  { %169 = vmatmul.f32.gmra.mxu0 %v36_v42  ;;  %v361_v42 = vld [vmem:[%s1999_s3 + $0x128] sm:$0xff]  ;;  %419 = vmatpush.msrb.mxu3 %v398_v43 }
  0x4a   :  { %382 = vmatpush.msrb.mxu2 %v361_v42  ;;  %v624_v43 = vld [vmem:[%s1999_s3 + $0x4c8] sm:$0xff] }
  0x4b   :  { %420 = vmatpush.msrb.mxu3 %v397_v46  ;;  %v472_v46 = vld [vmem:[%s1999_s3 + $0x2a8] sm:$0xff] }
  0x4c   :  { %383 = vmatpush.msrb.mxu2 %v360_v45  ;;  %v439_v45 = vld [vmem:[%s1999_s3 + $0x248] sm:$0xff] }
  0x4d   :  { %421 = vmatpush.msrb.mxu3 %v396_v49  ;;  %v471_v49 = vld [vmem:[%s1999_s3 + $0x2a0] sm:$0xff] }
  0x4e   :  { %384 = vmatpush.msrb.mxu2 %v359_v48  ;;  %v438_v48 = vld [vmem:[%s1999_s3 + $0x240] sm:$0xff] }
  0x50   :  { %925 = vmatmul.msk.f32.gmra.mxu1 %vm89_vm0, %v41_v53  ;;  %v395_v53 = vld [vmem:[%s1999_s3 + $0x190] sm:$0xff] }
  0x51   :  { %172 = vmatmul.f32.gmra.mxu0 %v38_v52  ;;  %v358_v52 = vld [vmem:[%s1999_s3 + $0x110] sm:$0xff]  ;;  %422 = vmatpush.msrb.mxu3 %v395_v53  ;;  %v586_v53 = vld [vmem:[%s1999_s3 + $0x440] sm:$0xff] }
  0x52   :  { %385 = vmatpush.msrb.mxu2 %v358_v52  ;;  %v470_v52 = vld [vmem:[%s1999_s3 + $0x298] sm:$0xff] }
  0x53   :  { %423 = vmatpush.msrb.mxu3 %v394_v55  ;;  %v469_v55 = vld [vmem:[%s1999_s3 + $0x290] sm:$0xff] }
  0x54   :  { %386 = vmatpush.msrb.mxu2 %v357_v54  ;;  %v436_v54 = vld [vmem:[%s1999_s3 + $0x230] sm:$0xff] }
  0x55   :  { %424 = vmatpush.msrb.mxu3 %v393_v58  ;;  %v623_v58 = vld [vmem:[%s1999_s3 + $0x4c0] sm:$0xff] }
  0x56   :  { %387 = vmatpush.msrb.mxu2 %v356_v57 }
  0x58   :  { %926 = vmatmul.msk.f32.gmra.mxu1 %vm89_vm0, %v43_v63 }
  0x59   :  { %175 = vmatmul.f32.gmra.mxu0 %v40_v62  ;;  %v591_v62 = vld [vmem:[%s1999_s3 + $0x468] sm:$0xff] }
  0x5a   :  { %596 = vmatpush.msrb.mxu1 %v591_v62  ;;  %v434_v62 = vld [vmem:[%s1999_s3 + $0x220] sm:$0xff] }
  0x5c   :  { %597 = vmatpush.msrb.mxu1 %v590_v3  ;;  %v555_v3 = vld [vmem:[%s1999_s3 + $0x3f0] sm:$0xff] }
  0x5e   :  { %598 = vmatpush.msrb.mxu1 %v589_v11 }
  0x60   :  { %927 = vmatmul.msk.f32.gmra.mxu1 %vm89_vm0, %v45_v9 }
  0x61   :  { %178 = vmatmul.f32.gmra.mxu0 %v42_v8  ;;  %599 = vmatpush.msrb.mxu1 %v588_v23  ;;  %v621_v23 = vld [vmem:[%s1999_s3 + $0x4b0] sm:$0xff] }
  0x68   :  { %928 = vmatmul.msk.f32.gmra.mxu1 %vm89_vm0, %v47_v19  ;;  %v479_v19 = vld [vmem:[%s1999_s3 + $0x2e0] sm:$0xff] }
  0x69   :  { %181 = vmatmul.f32.gmra.mxu0 %v44_v18 }
  0x70   :  { %929 = vmatmul.msk.f32.gmra.mxu1 %vm89_vm0, %v49_v29 }
  0x71   :  { %184 = vmatmul.f32.gmra.mxu0 %v46_v28  ;;  %v625_v28 = vld [vmem:[%s1999_s3 + $0x4d0] sm:$0xff] }
  0x72   :  { %636 = vmatpush.msrb.mxu0 %v625_v28  ;;  %v581_v28 = vld [vmem:[%s1999_s3 + $0x418] sm:$0xff] }
  0x74   :  { %637 = vmatpush.msrb.mxu0 %v624_v43  ;;  %v547_v43 = vld [vmem:[%s1999_s3 + $0x3b0] sm:$0xff] }
  0x76   :  { %638 = vmatpush.msrb.mxu0 %v623_v58  ;;  %v544_v58 = vld [vmem:[%s1999_s3 + $0x398] sm:$0xff] }
  0x78   :  { %930 = vmatmul.msk.f32.gmra.mxu1 %vm89_vm0, %v51_v35 }
  0x79   :  { %187 = vmatmul.f32.gmra.mxu0 %v48_v34  ;;  %v475_v34 = vld [vmem:[%s1999_s3 + $0x2c0] sm:$0xff] }
  0x80   :  { %931 = vmatmul.msk.f32.gmra.mxu1 %vm89_vm0, %v53_v39  ;;  %v440_v39 = vld [vmem:[%s1999_s3 + $0x250] sm:$0xff] }
  0x81   :  { %190 = vmatmul.f32.gmra.mxu0 %v50_v38  ;;  %v587_v38 = vld [vmem:[%s1999_s3 + $0x448] sm:$0xff] }
  0x82   :  { %600 = vmatpush.msrb.mxu1 %v587_v38  ;;  %v515_v38 = vld [vmem:[%s1999_s3 + $0x358] sm:$0xff] }
  0x84   :  { %601 = vmatpush.msrb.mxu1 %v586_v53 }
  0x88   :  { %932 = vmatmul.msk.f32.gmra.mxu1 %vm89_vm0, %v55_v51  ;;  %v437_v51 = vld [vmem:[%s1999_s3 + $0x238] sm:$0xff] }
  0x89   :  { %193 = vmatmul.f32.gmra.mxu0 %v52_v50 }
  0x90   :  { %933 = vmatmul.msk.f32.gmra.mxu1 %vm89_vm0, %v57_v60  ;;  %v468_v60 = vld [vmem:[%s1999_s3 + $0x288] sm:$0xff] }
  0x91   :  { %196 = vmatmul.f32.gmra.mxu0 %v54_v59  ;;  %v435_v59 = vld [vmem:[%s1999_s3 + $0x228] sm:$0xff] }
  0x95   :  { %v220_v63 = vpop.f32.mrf.mxu1 }
  0x99   :  { %199 = vmatmul.f32.gmra.mxu0 %v56_v0  ;;  %v556_v0 = vld [vmem:[%s1999_s3 + $0x3f8] sm:$0xff] }
  0x9d   :  { %v223_v5 = vpop.f32.mrf.mxu1 }
  0x9e   :  { %v155_v4 = vpop.f32.mrf.mxu0 }
  0x9f   :  { %v156_v7 = vadd.f32 %v1384_v2, %v155_v4  ;;  %v585_v4 = vld [vmem:[%s1999_s3 + $0x438] sm:$0xff] }
  0xa0   :  { %602 = vmatpush.msrb.mxu1 %v585_v4  ;;  %v737_v4 = vld [vmem:[%s1999_s3 + $0x658] sm:$0xff] }
  0xa1   :  { %v221_v8 = vadd.f32 %v220_v63, %v156_v7  ;;  %v467_v63 = vld [vmem:[%s1999_s3 + $0x280] sm:$0xff] }
  0xa3   :  { %v268_v9 = vmax.f32 %v221_v8, 0.0  ;;  %v554_v8 = vld [vmem:[%s1999_s3 + $0x3e8] sm:$0xff] }
  0xa5   :  { %352 = vmatmul.f32.vlgmr.msra.gmra.mxu3 %v268_v9  ;;  %v226_v14 = vpop.f32.mrf.mxu1 }
  0xa6   :  { %v158_v13 = vpop.f32.mrf.mxu0  ;;  %483 = vmatpush.msra.mxu3 %v482_v10  ;;  %v622_v10 = vld [vmem:[%s1999_s3 + $0x4b8] sm:$0xff] }
  0xa7   :  { %v159_v16 = vadd.f32 %v1384_v2, %v158_v13  ;;  %639 = vmatpush.msrb.mxu0 %v622_v10  ;;  %v584_v13 = vld [vmem:[%s1999_s3 + $0x430] sm:$0xff] }
  0xa8   :  { %484 = vmatpush.msra.mxu3 %v481_v12  ;;  %v431_v12 = vld [vmem:[%s1999_s3 + $0x208] sm:$0xff]  ;;  %603 = vmatpush.msrb.mxu1 %v584_v13  ;;  %v736_v10 = vld [vmem:[%s1999_s3 + $0x650] sm:$0xff] }
  0xa9   :  { %v224_v18 = vadd.f32 %v223_v5, %v159_v16  ;;  %640 = vmatpush.msrb.mxu0 %v621_v23  ;;  %v703_v23 = vld [vmem:[%s1999_s3 + $0x5f0] sm:$0xff] }
  0xaa   :  { %485 = vmatpush.msra.mxu3 %v480_v17  ;;  %v430_v17 = vld [vmem:[%s1999_s3 + $0x200] sm:$0xff] }
  0xab   :  { %v269_v20 = vmax.f32 %v224_v18, 0.0  ;;  %v583_v18 = vld [vmem:[%s1999_s3 + $0x428] sm:$0xff] }
  0xac   :  { %486 = vmatpush.msra.mxu3 %v479_v19  ;;  %604 = vmatpush.msrb.mxu1 %v583_v18 }
  0xad   :  { %332 = vmatmul.f32.vlgmr.msra.gmra.mxu2 %v269_v20  ;;  %v229_v27 = vpop.f32.mrf.mxu1  ;;  %v519_v20 = vld [vmem:[%s1999_s3 + $0x378] sm:$0xff] }
  0xae   :  { %446 = vmatpush.msra.mxu2 %v445_v21  ;;  %v161_v26 = vpop.f32.mrf.mxu0  ;;  %487 = vmatpush.msra.mxu3 %v478_v22  ;;  %v552_v21 = vld [vmem:[%s1999_s3 + $0x3d8] sm:$0xff]  ;;  %v582_v22 = vld [vmem:[%s1999_s3 + $0x420] sm:$0xff] }
  0xaf   :  { %v162_v29 = vadd.f32 %v1384_v2, %v161_v26  ;;  %605 = vmatpush.msrb.mxu1 %v582_v22  ;;  %v506_v22 = vld [vmem:[%s1999_s3 + $0x310] sm:$0xff] }
  0xb0   :  { %447 = vmatpush.msra.mxu2 %v444_v24  ;;  %488 = vmatpush.msra.mxu3 %v477_v25  ;;  %v518_v24 = vld [vmem:[%s1999_s3 + $0x370] sm:$0xff] }
  0xb1   :  { %v227_v32 = vadd.f32 %v226_v14, %v162_v29  ;;  %v553_v14 = vld [vmem:[%s1999_s3 + $0x3e0] sm:$0xff]  ;;  %v551_v25 = vld [vmem:[%s1999_s3 + $0x3d0] sm:$0xff]  ;;  %v620_v29 = vld [vmem:[%s1999_s3 + $0x4a8] sm:$0xff]  ;;  %606 = vmatpush.msrb.mxu1 %v581_v28 }
  0xb2   :  { %448 = vmatpush.msra.mxu2 %v443_v30  ;;  %489 = vmatpush.msra.mxu3 %v476_v31  ;;  %v517_v30 = vld [vmem:[%s1999_s3 + $0x368] sm:$0xff] }
  0xb3   :  { %v270_v35 = vmax.f32 %v227_v32, 0.0  ;;  %v550_v31 = vld [vmem:[%s1999_s3 + $0x3c8] sm:$0xff]  ;;  %v580_v32 = vld [vmem:[%s1999_s3 + $0x410] sm:$0xff]  ;;  %641 = vmatpush.msrb.mxu0 %v620_v29 }
  0xb4   :  { %449 = vmatpush.msra.mxu2 %v442_v33  ;;  %490 = vmatpush.msra.mxu3 %v475_v34  ;;  %v619_v33 = vld [vmem:[%s1999_s3 + $0x4a0] sm:$0xff]  ;;  %v505_v28 = vld [vmem:[%s1999_s3 + $0x308] sm:$0xff] }
  0xb5   :  { %388 = vmatmul.f32.vlgmr.msrb.gmra.mxu2 %v270_v35  ;;  %v232_v42 = vpop.f32.mrf.mxu1  ;;  %v516_v34 = vld [vmem:[%s1999_s3 + $0x360] sm:$0xff]  ;;  %607 = vmatpush.msrb.mxu1 %v580_v32  ;;  %v732_v32 = vld [vmem:[%s1999_s3 + $0x630] sm:$0xff] }
  0xb6   :  { %450 = vmatpush.msra.mxu2 %v441_v36  ;;  %v164_v41 = vpop.f32.mrf.mxu0  ;;  %491 = vmatpush.msra.mxu3 %v474_v37  ;;  %v549_v35 = vld [vmem:[%s1999_s3 + $0x3c0] sm:$0xff]  ;;  %v579_v36 = vld [vmem:[%s1999_s3 + $0x408] sm:$0xff]  ;;  %v618_v37 = vld [vmem:[%s1999_s3 + $0x498] sm:$0xff] }
  0xb7   :  { %v165_v44 = vadd.f32 %v1384_v2, %v164_v41  ;;  %642 = vmatpush.msrb.mxu0 %v619_v33  ;;  %608 = vmatpush.msrb.mxu1 %v579_v36  ;;  %v617_v41 = vld [vmem:[%s1999_s3 + $0x490] sm:$0xff]  ;;  %v504_v33 = vld [vmem:[%s1999_s3 + $0x300] sm:$0xff] }
  0xb8   :  { %451 = vmatpush.msra.mxu2 %v440_v39  ;;  %492 = vmatpush.msra.mxu3 %v473_v40  ;;  %v548_v39 = vld [vmem:[%s1999_s3 + $0x3b8] sm:$0xff]  ;;  %v578_v40 = vld [vmem:[%s1999_s3 + $0x400] sm:$0xff] }
  0xb9   :  { %v230_v47 = vadd.f32 %v229_v27, %v165_v44  ;;  %643 = vmatpush.msrb.mxu0 %v618_v37  ;;  %609 = vmatpush.msrb.mxu1 %v578_v40  ;;  %v667_v37 = vld [vmem:[%s1999_s3 + $0x578] sm:$0xff]  ;;  %v771_v40 = vld [vmem:[%s1999_s3 + $0x6c0] sm:$0xff] }
  0xba   :  { %452 = vmatpush.msra.mxu2 %v439_v45  ;;  %493 = vmatpush.msra.mxu3 %v472_v46  ;;  %v616_v46 = vld [vmem:[%s1999_s3 + $0x488] sm:$0xff] }
  0xbb   :  { %v271_v50 = vmax.f32 %v230_v47, 0.0  ;;  %v741_v47 = vld [vmem:[%s1999_s3 + $0x678] sm:$0xff]  ;;  %644 = vmatpush.msrb.mxu0 %v617_v41  ;;  %v731_v41 = vld [vmem:[%s1999_s3 + $0x628] sm:$0xff] }
  0xbc   :  { %453 = vmatpush.msra.mxu2 %v438_v48  ;;  %494 = vmatpush.msra.mxu3 %v471_v49  ;;  %v513_v48 = vld [vmem:[%s1999_s3 + $0x348] sm:$0xff] }
  0xbd   :  { %425 = vmatmul.f32.vlgmr.msrb.gmra.mxu3 %v271_v50  ;;  %v235_v57 = vpop.f32.mrf.mxu1  ;;  %v546_v49 = vld [vmem:[%s1999_s3 + $0x3a8] sm:$0xff]  ;;  %742 = vmatpush.msra.mxu1 %v741_v47  ;;  %v615_v50 = vld [vmem:[%s1999_s3 + $0x480] sm:$0xff] }
  0xbe   :  { %454 = vmatpush.msra.mxu2 %v437_v51  ;;  %v167_v56 = vpop.f32.mrf.mxu0  ;;  %495 = vmatpush.msra.mxu3 %v470_v52  ;;  %v740_v51 = vld [vmem:[%s1999_s3 + $0x670] sm:$0xff]  ;;  %v512_v52 = vld [vmem:[%s1999_s3 + $0x340] sm:$0xff]  ;;  %v665_v47 = vld [vmem:[%s1999_s3 + $0x568] sm:$0xff] }
  0xbf   :  { %v168_v61 = vadd.f32 %v1384_v2, %v167_v56  ;;  %645 = vmatpush.msrb.mxu0 %v616_v46  ;;  %743 = vmatpush.msra.mxu1 %v740_v51  ;;  %v739_v56 = vld [vmem:[%s1999_s3 + $0x668] sm:$0xff]  ;;  %v730_v46 = vld [vmem:[%s1999_s3 + $0x620] sm:$0xff] }
  0xc0   :  { %455 = vmatpush.msra.mxu2 %v436_v54  ;;  %496 = vmatpush.msra.mxu3 %v469_v55  ;;  %v545_v54 = vld [vmem:[%s1999_s3 + $0x3a0] sm:$0xff]  ;;  %v778_v55 = vld [vmem:[%s1999_s3 + $0x6f8] sm:$0xff] }
  0xc1   :  { %v233_v5 = vadd.f32 %v232_v42, %v168_v61  ;;  %v514_v42 = vld [vmem:[%s1999_s3 + $0x350] sm:$0xff]  ;;  %646 = vmatpush.msrb.mxu0 %v615_v50  ;;  %744 = vmatpush.msra.mxu1 %v739_v56  ;;  %v729_v50 = vld [vmem:[%s1999_s3 + $0x618] sm:$0xff]  ;;  %v664_v51 = vld [vmem:[%s1999_s3 + $0x560] sm:$0xff] }
  0xc2   :  { %456 = vmatpush.msra.mxu2 %v435_v59  ;;  %497 = vmatpush.msra.mxu3 %v468_v60  ;;  %v777_v59 = vld [vmem:[%s1999_s3 + $0x6f0] sm:$0xff]  ;;  %v738_v60 = vld [vmem:[%s1999_s3 + $0x660] sm:$0xff]  ;;  %v663_v56 = vld [vmem:[%s1999_s3 + $0x558] sm:$0xff] }
  0xc3   :  { %v272_v15 = vmax.f32 %v233_v5, 0.0  ;;  %v510_v61 = vld [vmem:[%s1999_s3 + $0x330] sm:$0xff]  ;;  %779 = vmatpush.msra.mxu0 %v778_v55  ;;  %745 = vmatpush.msra.mxu1 %v738_v60  ;;  %v509_v5 = vld [vmem:[%s1999_s3 + $0x328] sm:$0xff] }
  0xc4   :  { %457 = vmatpush.msra.mxu2 %v434_v62  ;;  %498 = vmatpush.msra.mxu3 %v467_v63  ;;  %v543_v63 = vld [vmem:[%s1999_s3 + $0x390] sm:$0xff] }
  0xc5   :  { %v1523_v9 = vpop.f32.mrf.mxu1  ;;  %780 = vmatpush.msra.mxu0 %v777_v59  ;;  %746 = vmatpush.msra.mxu1 %v737_v4  ;;  %v728_v55 = vld [vmem:[%s1999_s3 + $0x610] sm:$0xff]  ;;  %v727_v59 = vld [vmem:[%s1999_s3 + $0x608] sm:$0xff] }
  0xc6   :  { %557 = vmatpush.msrb.mxu3 %v556_v0  ;;  %458 = vmatpush.msra.mxu2 %v433_v1  ;;  %v170_v7 = vpop.f32.mrf.mxu0  ;;  %v662_v60 = vld [vmem:[%s1999_s3 + $0x550] sm:$0xff] }
  0xc7   :  { %v171_v11 = vadd.f32 %v1384_v2, %v170_v7  ;;  %v542_v7 = vld [vmem:[%s1999_s3 + $0x388] sm:$0xff]  ;;  %747 = vmatpush.msra.mxu1 %v736_v10  ;;  %v765_v4 = vld [vmem:[%s1999_s3 + $0x690] sm:$0xff]  ;;  %v659_v10 = vld [vmem:[%s1999_s3 + $0x538] sm:$0xff] }
  0xc8   :  { %558 = vmatpush.msrb.mxu3 %v555_v3  ;;  %459 = vmatpush.msra.mxu2 %v432_v6  ;;  %v776_v3 = vld [vmem:[%s1999_s3 + $0x6e8] sm:$0xff] }
  0xc9   :  { %v236_v16 = vadd.f32 %v235_v57, %v171_v11  ;;  %v511_v57 = vld [vmem:[%s1999_s3 + $0x338] sm:$0xff]  ;;  %781 = vmatpush.msra.mxu0 %v776_v3  ;;  %v694_v3 = vld [vmem:[%s1999_s3 + $0x5a8] sm:$0xff] }
  0xca   :  { %559 = vmatpush.msrb.mxu3 %v554_v8  ;;  %460 = vmatpush.msra.mxu2 %v431_v12  ;;  %v775_v8 = vld [vmem:[%s1999_s3 + $0x6e0] sm:$0xff] }
  0xcb   :  { %v273_v19 = vmax.f32 %v236_v16, 0.0  ;;  %v508_v12 = vld [vmem:[%s1999_s3 + $0x320] sm:$0xff]  ;;  %782 = vmatpush.msra.mxu0 %v775_v8  ;;  %v764_v8 = vld [vmem:[%s1999_s3 + $0x688] sm:$0xff] }
  0xcc   :  { %560 = vmatpush.msrb.mxu3 %v553_v14  ;;  %461 = vmatpush.msra.mxu2 %v430_v17  ;;  %v541_v14 = vld [vmem:[%s1999_s3 + $0x380] sm:$0xff]  ;;  %v507_v17 = vld [vmem:[%s1999_s3 + $0x318] sm:$0xff] }
  0xcd   :  { %462 = vmatmul.f32.vlgmr.msra.gmra.mxu2 %v272_v15  ;;  %499 = vmatmul.f32.vlgmr.msra.gmra.mxu3 %v273_v19  ;;  %v1564_v27 = vpop.f32.mrf.mxu1  ;;  %v735_v15 = vld [vmem:[%s1999_s3 + $0x648] sm:$0xff]  ;;  %v704_v19 = vld [vmem:[%s1999_s3 + $0x5f8] sm:$0xff] }
  0xce   :  { %520 = vmatpush.msrb.mxu2 %v519_v20  ;;  %561 = vmatpush.msrb.mxu3 %v552_v21  ;;  %v1562_v26 = vpop.f32.mrf.mxu0  ;;  %v774_v20 = vld [vmem:[%s1999_s3 + $0x6d8] sm:$0xff]  ;;  %v734_v21 = vld [vmem:[%s1999_s3 + $0x640] sm:$0xff] }
  0xcf   :  { %v174_v16 = vadd.f32 %v1384_v2, %v1562_v26  ;;  %748 = vmatpush.msra.mxu1 %v735_v15  ;;  %v733_v26 = vld [vmem:[%s1999_s3 + $0x638] sm:$0xff]  ;;  %783 = vmatpush.msra.mxu0 %v774_v20  ;;  %v690_v20 = vld [vmem:[%s1999_s3 + $0x588] sm:$0xff] }
  0xd0   :  { %521 = vmatpush.msrb.mxu2 %v518_v24  ;;  %562 = vmatpush.msrb.mxu3 %v551_v25  ;;  %v773_v25 = vld [vmem:[%s1999_s3 + $0x6d0] sm:$0xff] }
  0xd1   :  { %749 = vmatpush.msra.mxu1 %v734_v21  ;;  %784 = vmatpush.msra.mxu0 %v773_v25 }
  0xd2   :  { %522 = vmatpush.msrb.mxu2 %v517_v30  ;;  %563 = vmatpush.msrb.mxu3 %v550_v31  ;;  %v702_v30 = vld [vmem:[%s1999_s3 + $0x5e8] sm:$0xff] }
  0xd3   :  { %750 = vmatpush.msra.mxu1 %v733_v26  ;;  %v655_v26 = vld [vmem:[%s1999_s3 + $0x518] sm:$0xff] }
  0xd4   :  { %523 = vmatpush.msrb.mxu2 %v516_v34  ;;  %564 = vmatpush.msrb.mxu3 %v549_v35  ;;  %v701_v35 = vld [vmem:[%s1999_s3 + $0x5e0] sm:$0xff] }
  0xd5   :  { %v244_v45 = vpop.f32.mrf.mxu1  ;;  %751 = vmatpush.msra.mxu1 %v732_v32 }
  0xd6   :  { %524 = vmatpush.msrb.mxu2 %v515_v38  ;;  %565 = vmatpush.msrb.mxu3 %v548_v39  ;;  %v176_v44 = vpop.f32.mrf.mxu0  ;;  %v700_v39 = vld [vmem:[%s1999_s3 + $0x5d8] sm:$0xff] }
  0xd7   :  { %v177_v53 = vadd.f32 %v1384_v2, %v176_v44  ;;  %752 = vmatpush.msra.mxu1 %v731_v41 }
  0xd8   :  { %525 = vmatpush.msrb.mxu2 %v514_v42  ;;  %566 = vmatpush.msrb.mxu3 %v547_v43  ;;  %v666_v42 = vld [vmem:[%s1999_s3 + $0x570] sm:$0xff] }
  0xd9   :  { %v242_v62 = vadd.f32 %v1564_v27, %v177_v53  ;;  %v239_v27 = vadd.f32 %v1523_v9, %v174_v16  ;;  %v772_v9 = vld [vmem:[%s1999_s3 + $0x6c8] sm:$0xff]  ;;  %v699_v43 = vld [vmem:[%s1999_s3 + $0x5d0] sm:$0xff]  ;;  %753 = vmatpush.msra.mxu1 %v730_v46 }
  0xda   :  { %526 = vmatpush.msrb.mxu2 %v513_v48  ;;  %567 = vmatpush.msrb.mxu3 %v546_v49  ;;  %v698_v48 = vld [vmem:[%s1999_s3 + $0x5c8] sm:$0xff]  ;;  %v769_v49 = vld [vmem:[%s1999_s3 + $0x6b0] sm:$0xff] }
  0xdb   :  { %v275_v11 = vmax.f32 %v242_v62, 0.0  ;;  %v274_v36 = vmax.f32 %v239_v27, 0.0  ;;  %785 = vmatpush.msra.mxu0 %v772_v9  ;;  %754 = vmatpush.msra.mxu1 %v729_v50  ;;  %v691_v16 = vld [vmem:[%s1999_s3 + $0x590] sm:$0xff]  ;;  %v813_v46 = vld [vmem:[%s1999_s3 + $0x768] sm:$0xff]  ;;  %v845_v50 = vld [vmem:[%s1999_s3 + $0x7c0] sm:$0xff] }
  0xdc   :  { %527 = vmatpush.msrb.mxu2 %v512_v52  ;;  %568 = vmatpush.msrb.mxu3 %v545_v54  ;;  %v697_v52 = vld [vmem:[%s1999_s3 + $0x5c0] sm:$0xff]  ;;  %v768_v54 = vld [vmem:[%s1999_s3 + $0x6a8] sm:$0xff] }
  0xdd   :  { %v247_v1 = vpop.f32.mrf.mxu1  ;;  %786 = vmatpush.msra.mxu0 %v771_v40  ;;  %755 = vmatpush.msra.mxu1 %v728_v55  ;;  %v815_v40 = vld [vmem:[%s1999_s3 + $0x778] sm:$0xff] }
  0xde   :  { %528 = vmatpush.msrb.mxu2 %v511_v57  ;;  %569 = vmatpush.msrb.mxu3 %v544_v58  ;;  %v179_v0 = vpop.f32.mrf.mxu0  ;;  %v696_v57 = vld [vmem:[%s1999_s3 + $0x5b8] sm:$0xff]  ;;  %v767_v58 = vld [vmem:[%s1999_s3 + $0x6a0] sm:$0xff] }
  0xdf   :  { %v180_v6 = vadd.f32 %v1384_v2, %v179_v0  ;;  %v726_v0 = vld [vmem:[%s1999_s3 + $0x600] sm:$0xff]  ;;  %756 = vmatpush.msra.mxu1 %v727_v59 }
  0xe0   :  { %529 = vmatpush.msrb.mxu2 %v510_v61  ;;  %570 = vmatpush.msrb.mxu3 %v543_v63  ;;  %v695_v61 = vld [vmem:[%s1999_s3 + $0x5b0] sm:$0xff]  ;;  %v766_v63 = vld [vmem:[%s1999_s3 + $0x698] sm:$0xff]  ;;  %v841_v59 = vld [vmem:[%s1999_s3 + $0x7a0] sm:$0xff] }
  0xe1   :  { %v245_v13 = vadd.f32 %v244_v45, %v180_v6  ;;  %v770_v45 = vld [vmem:[%s1999_s3 + $0x6b8] sm:$0xff]  ;;  %757 = vmatpush.msra.mxu1 %v726_v0  ;;  %v806_v0 = vld [vmem:[%s1999_s3 + $0x730] sm:$0xff] }
  0xe2   :  { %530 = vmatpush.msrb.mxu2 %v509_v5  ;;  %571 = vmatpush.msrb.mxu3 %v542_v7  ;;  %v660_v5 = vld [vmem:[%s1999_s3 + $0x540] sm:$0xff] }
  0xe3   :  { %v276_v18 = vmax.f32 %v245_v13, 0.0  ;;  %787 = vmatpush.msra.mxu0 %v770_v45  ;;  %v693_v7 = vld [vmem:[%s1999_s3 + $0x5a0] sm:$0xff] }
  0xe4   :  { %531 = vmatpush.msrb.mxu2 %v508_v12  ;;  %572 = vmatpush.msrb.mxu3 %v541_v14  ;;  %v763_v13 = vld [vmem:[%s1999_s3 + $0x680] sm:$0xff]  ;;  %v658_v14 = vld [vmem:[%s1999_s3 + $0x530] sm:$0xff] }
  0xe5   :  { %573 = vmatmul.f32.vlgmr.msrb.gmra.mxu3 %v275_v11  ;;  %610 = vmatmul.f32.vlgmr.msrb.gmra.mxu1 %v276_v18  ;;  %v1726_v31 = vpop.f32.mrf.mxu1  ;;  %v692_v11 = vld [vmem:[%s1999_s3 + $0x598] sm:$0xff]  ;;  %v657_v18 = vld [vmem:[%s1999_s3 + $0x528] sm:$0xff] }
  0xe6   :  { %532 = vmatpush.msrb.mxu2 %v507_v17  ;;  %705 = vmatpush.msra.mxu3 %v704_v19  ;;  %v182_v24 = vpop.f32.mrf.mxu0 }
  0xe7   :  { %v183_v29 = vadd.f32 %v1384_v2, %v182_v24  ;;  %788 = vmatpush.msra.mxu0 %v769_v49  ;;  %v689_v24 = vld [vmem:[%s1999_s3 + $0x580] sm:$0xff] }
  0xe8   :  { %533 = vmatpush.msrb.mxu2 %v506_v22  ;;  %706 = vmatpush.msra.mxu3 %v703_v23  ;;  %v656_v22 = vld [vmem:[%s1999_s3 + $0x520] sm:$0xff] }
  0xe9   :  { %v248_v34 = vadd.f32 %v247_v1, %v183_v29  ;;  %789 = vmatpush.msra.mxu0 %v768_v54  ;;  %v661_v1 = vld [vmem:[%s1999_s3 + $0x548] sm:$0xff]  ;;  %v654_v29 = vld [vmem:[%s1999_s3 + $0x510] sm:$0xff]  ;;  %v812_v49 = vld [vmem:[%s1999_s3 + $0x760] sm:$0xff] }
  0xea   :  { %534 = vmatpush.msrb.mxu2 %v505_v28  ;;  %707 = vmatpush.msra.mxu3 %v702_v30  ;;  %v852_v28 = vld [vmem:[%s1999_s3 + $0x7f8] sm:$0xff]  ;;  %v851_v30 = vld [vmem:[%s1999_s3 + $0x7f0] sm:$0xff] }
  0xeb   :  { %v277_v38 = vmax.f32 %v248_v34, 0.0  ;;  %790 = vmatpush.msra.mxu0 %v767_v58  ;;  %v653_v34 = vld [vmem:[%s1999_s3 + $0x508] sm:$0xff]  ;;  %v843_v54 = vld [vmem:[%s1999_s3 + $0x7b0] sm:$0xff]  ;;  %v808_v58 = vld [vmem:[%s1999_s3 + $0x740] sm:$0xff] }
  0xec   :  { %535 = vmatpush.msrb.mxu2 %v504_v33  ;;  %708 = vmatpush.msra.mxu3 %v701_v35 }
  0xed   :  { %536 = vmatmul.f32.vlgmr.msrb.gmra.mxu2 %v274_v36  ;;  %647 = vmatmul.f32.vlgmr.msrb.gmra.mxu0 %v277_v38  ;;  %v253_v53 = vpop.f32.mrf.mxu1  ;;  %v850_v36 = vld [vmem:[%s1999_s3 + $0x7e8] sm:$0xff] }
  0xee   :  { %668 = vmatpush.msra.mxu2 %v667_v37  ;;  %709 = vmatpush.msra.mxu3 %v700_v39  ;;  %v1758_v44 = vpop.f32.mrf.mxu0  ;;  %v652_v37 = vld [vmem:[%s1999_s3 + $0x500] sm:$0xff] }
  0xef   :  { %791 = vmatpush.msra.mxu0 %v766_v63  ;;  %v186_v25 = vadd.f32 %v1384_v2, %v1758_v44  ;;  %v847_v44 = vld [vmem:[%s1999_s3 + $0x7d0] sm:$0xff]  ;;  %v840_v63 = vld [vmem:[%s1999_s3 + $0x798] sm:$0xff] }
  0xf0   :  { %669 = vmatpush.msra.mxu2 %v666_v42  ;;  %710 = vmatpush.msra.mxu3 %v699_v43  ;;  %v848_v42 = vld [vmem:[%s1999_s3 + $0x7d8] sm:$0xff]  ;;  %v814_v43 = vld [vmem:[%s1999_s3 + $0x770] sm:$0xff] }
  0xf1   :  { %792 = vmatpush.msra.mxu0 %v765_v4  ;;  %v251_v33 = vadd.f32 %v1726_v31, %v186_v25  ;;  %v849_v31 = vld [vmem:[%s1999_s3 + $0x7e0] sm:$0xff]  ;;  %v805_v4 = vld [vmem:[%s1999_s3 + $0x728] sm:$0xff] }
  0xf2   :  { %670 = vmatpush.msra.mxu2 %v665_v47  ;;  %711 = vmatpush.msra.mxu3 %v698_v48  ;;  %v846_v47 = vld [vmem:[%s1999_s3 + $0x7c8] sm:$0xff] }
  0xf3   :  { %793 = vmatpush.msra.mxu0 %v764_v8  ;;  %v278_v39 = vmax.f32 %v251_v33, 0.0  ;;  %v837_v8 = vld [vmem:[%s1999_s3 + $0x780] sm:$0xff] }
  0xf4   :  { %671 = vmatpush.msra.mxu2 %v664_v51  ;;  %712 = vmatpush.msra.mxu3 %v697_v52  ;;  %v811_v51 = vld [vmem:[%s1999_s3 + $0x758] sm:$0xff] }
  0xf5   :  { %v256_v12 = vpop.f32.mrf.mxu1  ;;  %794 = vmatpush.msra.mxu0 %v763_v13  ;;  %v844_v52 = vld [vmem:[%s1999_s3 + $0x7b8] sm:$0xff] }
  0xf6   :  { %672 = vmatpush.msra.mxu2 %v663_v56  ;;  %713 = vmatpush.msra.mxu3 %v696_v57  ;;  %v188_v62 = vpop.f32.mrf.mxu0  ;;  %v809_v56 = vld [vmem:[%s1999_s3 + $0x748] sm:$0xff] }
  0xf7   :  { %v189_v6 = vadd.f32 %v1384_v2, %v188_v62  ;;  %v842_v57 = vld [vmem:[%s1999_s3 + $0x7a8] sm:$0xff]  ;;  %v807_v62 = vld [vmem:[%s1999_s3 + $0x738] sm:$0xff] }
  0xf8   :  { %673 = vmatpush.msra.mxu2 %v662_v60  ;;  %714 = vmatpush.msra.mxu3 %v695_v61 }
  0xf9   :  { %v254_v15 = vadd.f32 %v253_v53, %v189_v6  ;;  %v810_v53 = vld [vmem:[%s1999_s3 + $0x750] sm:$0xff]  ;;  %v804_v6 = vld [vmem:[%s1999_s3 + $0x720] sm:$0xff] }
  0xfa   :  { %674 = vmatpush.msra.mxu2 %v661_v1  ;;  %715 = vmatpush.msra.mxu3 %v694_v3  ;;  %v839_v3 = vld [vmem:[%s1999_s3 + $0x790] sm:$0xff] }
  0xfb   :  { %v279_v21 = vmax.f32 %v254_v15, 0.0 }
  0xfc   :  { %675 = vmatpush.msra.mxu2 %v660_v5  ;;  %716 = vmatpush.msra.mxu3 %v693_v7  ;;  %v838_v5 = vld [vmem:[%s1999_s3 + $0x788] sm:$0xff] }
  0xfd   :  { %v259_v32 = vpop.f32.mrf.mxu1 }
  0xfe   :  { %676 = vmatpush.msra.mxu2 %v659_v10  ;;  %717 = vmatpush.msra.mxu3 %v692_v11  ;;  %v191_v17 = vpop.f32.mrf.mxu0  ;;  %v803_v11 = vld [vmem:[%s1999_s3 + $0x718] sm:$0xff] }
  0xff   :  { %v192_v19 = vadd.f32 %v1384_v2, %v191_v17 }
 0x100   :  { %677 = vmatpush.msra.mxu2 %v658_v14  ;;  %718 = vmatpush.msra.mxu3 %v691_v16  ;;  %v801_v14 = vld [vmem:[%s1999_s3 + $0x708] sm:$0xff] }
 0x101   :  { %v257_v23 = vadd.f32 %v256_v12, %v192_v19  ;;  %v802_v12 = vld [vmem:[%s1999_s3 + $0x710] sm:$0xff] }
 0x102   :  { %678 = vmatpush.msra.mxu2 %v657_v18  ;;  %719 = vmatpush.msra.mxu3 %v690_v20 }
 0x103   :  { %v280_v27 = vmax.f32 %v257_v23, 0.0 }
 0x104   :  { %679 = vmatpush.msra.mxu2 %v656_v22  ;;  %720 = vmatpush.msra.mxu3 %v689_v24 }
 0x105   :  { %721 = vmatmul.f32.vlgmr.msra.gmra.mxu3 %v279_v21  ;;  %758 = vmatmul.f32.vlgmr.msra.gmra.mxu1 %v280_v27  ;;  %v262_v48 = vpop.f32.mrf.mxu1 }
 0x106   :  { %680 = vmatpush.msra.mxu2 %v655_v26  ;;  %853 = vmatpush.msrb.mxu3 %v852_v28  ;;  %v194_v9 = vpop.f32.mrf.mxu0  ;;  %v883_v26 = vld [vmem:[%s2002_s5 + $0x18] sm:$0xff] }
 0x107   :  { %v195_v35 = vadd.f32 %v1384_v2, %v194_v9  ;;  %904 = vmatpush.msrb.mxu1 %v883_v26  ;;  %v881_v9 = vld [vmem:[%s2002_s5 + $0x8] sm:$0xff] }
 0x108   :  { %681 = vmatpush.msra.mxu2 %v654_v29  ;;  %854 = vmatpush.msrb.mxu3 %v851_v30  ;;  %v882_v29 = vld [vmem:[%s2002_s5 + $0x10] sm:$0xff] }
 0x109   :  { %v260_v38 = vadd.f32 %v259_v32, %v195_v35  ;;  %905 = vmatpush.msrb.mxu1 %v882_v29  ;;  %v880_v32 = vld [vmem:[%s2002_s5] sm:$0xff] }
 0x10a   :  { %682 = vmatpush.msra.mxu2 %v653_v34  ;;  %855 = vmatpush.msrb.mxu3 %v850_v36 }
 0x10b   :  { %v281_v41 = vmax.f32 %v260_v38, 0.0  ;;  %906 = vmatpush.msrb.mxu1 %v881_v9 }
 0x10c   :  { %683 = vmatpush.msra.mxu2 %v652_v37  ;;  %856 = vmatpush.msrb.mxu3 %v849_v31 }
 0x10d   :  { %684 = vmatmul.f32.vlgmr.msra.gmra.mxu2 %v278_v39  ;;  %795 = vmatmul.f32.vlgmr.msra.gmra.mxu0 %v281_v41  ;;  %v265_v61 = vpop.f32.mrf.mxu1 }
 0x10e   :  { %816 = vmatpush.msrb.mxu2 %v815_v40  ;;  %857 = vmatpush.msrb.mxu3 %v848_v42  ;;  %v197_v45 = vpop.f32.mrf.mxu0 }
 0x10f   :  { %v198_v10 = vadd.f32 %v1384_v2, %v197_v45  ;;  %907 = vmatpush.msrb.mxu1 %v880_v32 }
 0x110   :  { %817 = vmatpush.msrb.mxu2 %v814_v43  ;;  %858 = vmatpush.msrb.mxu3 %v847_v44 }
 0x111   :  { %v263_v13 = vadd.f32 %v262_v48, %v198_v10 }
 0x112   :  { %818 = vmatpush.msrb.mxu2 %v813_v46  ;;  %859 = vmatpush.msrb.mxu3 %v846_v47 }
 0x113   :  { %v282_v15 = vmax.f32 %v263_v13, 0.0 }
 0x114   :  { %819 = vmatpush.msrb.mxu2 %v812_v49  ;;  %860 = vmatpush.msrb.mxu3 %v845_v50  ;;  %v936_v49 = vld [vmem:[%s2000_s4] ss:$0 sm:$0xff] }
 0x116   :  { %820 = vmatpush.msrb.mxu2 %v811_v51  ;;  %861 = vmatpush.msrb.mxu3 %v844_v52  ;;  %v200_v55 = vpop.f32.mrf.mxu0 }
 0x117   :  { %v201_v60 = vadd.f32 %v1384_v2, %v200_v55  ;;  %v800_v2 = vld [vmem:[%s1999_s3 + $0x700] sm:$0xff] }
 0x118   :  { %821 = vmatpush.msrb.mxu2 %v810_v53  ;;  %862 = vmatpush.msrb.mxu3 %v843_v54  ;;  %v937_v53 = vld [vmem:[%s2001_s6] ss:$0 sm:$0xff] }
 0x119   :  { %v266_v1 = vadd.f32 %v265_v61, %v201_v60 }
 0x11a   :  { %822 = vmatpush.msrb.mxu2 %v809_v56  ;;  %863 = vmatpush.msrb.mxu3 %v842_v57 }
 0x11b   :  { %v283_v7 = vmax.f32 %v266_v1, 0.0 }
 0x11c   :  { %823 = vmatpush.msrb.mxu2 %v808_v58  ;;  %864 = vmatpush.msrb.mxu3 %v841_v59 }
 0x11e   :  { %824 = vmatpush.msrb.mxu2 %v807_v62  ;;  %865 = vmatpush.msrb.mxu3 %v840_v63 }
 0x120   :  { %825 = vmatpush.msrb.mxu2 %v806_v0  ;;  %866 = vmatpush.msrb.mxu3 %v839_v3 }
 0x122   :  { %826 = vmatpush.msrb.mxu2 %v805_v4  ;;  %867 = vmatpush.msrb.mxu3 %v838_v5 }
 0x124   :  { %827 = vmatpush.msrb.mxu2 %v804_v6  ;;  %868 = vmatpush.msrb.mxu3 %v837_v8 }
 0x125   :  { %869 = vmatmul.f32.vlgmr.msrb.gmra.mxu3 %v283_v7 }
 0x126   :  { %828 = vmatpush.msrb.mxu2 %v803_v11 }
 0x128   :  { %829 = vmatpush.msrb.mxu2 %v802_v12  ;;  %v353_v17 = vpop.f32.mrf.mxu3 }
 0x12a   :  { %830 = vmatpush.msrb.mxu2 %v801_v14 }
 0x12c   :  { %831 = vmatpush.msrb.mxu2 %v800_v2 }
 0x12d   :  { %832 = vmatmul.f32.vlgmr.msrb.gmra.mxu2 %v282_v15 }
 0x130   :  { %v333_v16 = vpop.f32.mrf.mxu2 }
 0x131   :  { %v354_v20 = vadd.f32 %v353_v17, %v333_v16 }
 0x138   :  { %v389_v18 = vpop.f32.mrf.mxu2 }
 0x139   :  { %v392_v22 = vadd.f32 %v389_v18, %v354_v20 }
 0x140   :  { %v426_v19 = vpop.f32.mrf.mxu3 }
 0x141   :  { %v429_v23 = vadd.f32 %v426_v19, %v392_v22 }
 0x150   :  { %v463_v21 = vpop.f32.mrf.mxu2  ;;  %v500_v25 = vpop.f32.mrf.mxu3 }
 0x151   :  { %v466_v24 = vadd.f32 %v463_v21, %v429_v23 }
 0x153   :  { %v503_v28 = vadd.f32 %v500_v25, %v466_v24 }
 0x162   :  { %v611_v35 = vpop.f32.mrf.mxu1 }
 0x168   :  { %v574_v33 = vpop.f32.mrf.mxu3 }
 0x16a   :  { %v648_v37 = vpop.f32.mrf.mxu0 }
 0x170   :  { %v537_v27 = vpop.f32.mrf.mxu2 }
 0x171   :  { %v540_v30 = vadd.f32 %v537_v27, %v503_v28 }
 0x173   :  { %v577_v34 = vadd.f32 %v574_v33, %v540_v30 }
 0x175   :  { %v614_v36 = vadd.f32 %v611_v35, %v577_v34 }
 0x177   :  { %v651_v31 = vadd.f32 %v648_v37, %v614_v36 }
 0x182   :  { %v759_v42 = vpop.f32.mrf.mxu1 }
 0x188   :  { %v722_v40 = vpop.f32.mrf.mxu3 }
 0x18a   :  { %v796_v44 = vpop.f32.mrf.mxu0 }
 0x190   :  { %v685_v38 = vpop.f32.mrf.mxu2 }
 0x191   :  { %v688_v39 = vadd.f32 %v685_v38, %v651_v31 }
 0x193   :  { %v725_v41 = vadd.f32 %v722_v40, %v688_v39 }
 0x195   :  { %v762_v43 = vadd.f32 %v759_v42, %v725_v41 }
 0x197   :  { %v799_v45 = vadd.f32 %v796_v44, %v762_v43 }
 0x1a8   :  { %v870_v47 = vpop.f32.mrf.mxu3 }
 0x1b0   :  { %v833_v46 = vpop.f32.mrf.mxu2 }
 0x1b1   :  { %v836_v48 = vadd.f32 %v833_v46, %v799_v45 }
 0x1b3   :  { %v873_v50 = vadd.f32 %v870_v47, %v836_v48 }
 0x1b5   :  { %v878_v51 = vadd.f32 %v936_v49, %v873_v50 }
 0x1b7   :  { %v879_v52 = vmax.f32 %v878_v51, 0.0 }
 0x1b9   :  { %934 = vmatmul.msk.f32.vlgmr.msrb.gmra.mxu1 %vm888_vm1, %v879_v52 }
 0x236   :  { %v909_v54 = vpop.f32.mrf.mxu1 }
 0x237   :  { %v910_v55 = vadd.f32 %v937_v53, %v909_v54 }
 0x239   :  { %913 = vst.msk [vmem:[%s2003_s7] sm:$0xff] %vm912_vm2, %v910_v55 }

</bundles_post_ra>
